<compile_context>
chip_gen: v6e
topology: v6e:2x2x1
jax: 0.10.0
libtpu: 0.0.40
codegen_flags: <defaults>
</compile_context>

<pallas_src>
import numpy as np
import jax
import jax.numpy as jnp
from jax.experimental import pallas as pl
from jax.experimental.pallas import tpu as pltpu

# ----------------------------- problem sizes -------------------------------
B, CI, CO = 2, 4, 4          # batch, in channels, out channels
H, W = 16, 16                # latitude, longitude
N_MODES = (8, 16)            # (l_max, 2*m_max) as in SphericalConv.n_modes
L = N_MODES[0]               # retained Legendre degrees
M = N_MODES[1] // 2          # retained longitudinal modes
HOUT, WOUT = H, W            # output_scaling_factor = None
N_LAYERS = 2                 # joint factorized conv has several sub-convs
INDICES = 1                  # which sub-conv this SubConv selects

HW = H * W                   # 256  -> lane-dense contraction / output width
LM = L * M                   # 64   -> retained spectral coefficients


# ----------------------------- fused Pallas kernel --------------------------
def _subconv_kernel(x_ref, fre_ref, fim_ref, wre_ref, wim_ref,
                    gre_ref, gim_ref, b_ref, o_ref):
    """Entire SubConv forward in one kernel invocation.

    x_ref  : (B, CI*HW)      f32 VMEM  input, (h,w) flattened into lanes
    f*_ref : (HW, LM)        f32 VMEM  folded DFT + Legendre analysis (re/im)
    w*_ref : (CI*CO, 1, LM)  f32 VMEM  spectral weights (re/im), row = i*CO+o
    g*_ref : (LM, HW)        f32 VMEM  folded inverse Legendre + iDFT (re/im)
    b_ref  : (CO,)           f32 SMEM  bias scalars
    o_ref  : (B, CO*HW)      f32 VMEM  output, (h,w) flattened into lanes
    """
    # ---- forward SHT: real input -> 2 real matmuls per input channel ----
    yre, yim = [], []
    for i in range(CI):
        xi = x_ref[:, i * HW:(i + 1) * HW]          # (B, HW), lane-aligned slice
        yre.append(jnp.dot(xi, fre_ref[...], preferred_element_type=jnp.float32))
        yim.append(jnp.dot(xi, fim_ref[...], preferred_element_type=jnp.float32))

    # ---- per output channel: complex channel mix (VPU) + inverse SHT ----
    for o in range(CO):
        zre = None
        zim = None
        for i in range(CI):
            wre = wre_ref[i * CO + o]               # (1, LM)
            wim = wim_ref[i * CO + o]
            # Gauss 3-multiply complex product, accumulated over input channels.
            t1 = yre[i] * wre
            t2 = yim[i] * wim
            t3 = (yre[i] + yim[i]) * (wre + wim)
            cre = t1 - t2
            cim = t3 - t1 - t2
            zre = cre if zre is None else zre + cre
            zim = cim if zim is None else zim + cim
        # Inverse SHT: only the real part of the spatial signal is needed, so
        # the dead imaginary output is never computed.
        out_o = (jnp.dot(zre, gre_ref[...], preferred_element_type=jnp.float32)
                 - jnp.dot(zim, gim_ref[...], preferred_element_type=jnp.float32))
        o_ref[:, o * HW:(o + 1) * HW] = out_o + b_ref[o]


def subconv_forward(x, fre, fim, wre, wim, gre, gim, bias_vec):
    """x: (B, CI, H, W) -> (B, CO, HOUT, WOUT).  One pallas_call, no glue."""
    x2 = x.reshape(B, CI * HW)                       # contiguous reshape (free)

    def vspec(shape):
        return pl.BlockSpec(shape, lambda *_: (0,) * len(shape))

    out2 = pl.pallas_call(
        _subconv_kernel,
        out_shape=jax.ShapeDtypeStruct((B, CO * HW), jnp.float32),
        grid=(1,),
        in_specs=[vspec(x2.shape),
                  vspec(fre.shape), vspec(fim.shape),
                  vspec(wre.shape), vspec(wim.shape),
                  vspec(gre.shape), vspec(gim.shape),
                  pl.BlockSpec(memory_space=pltpu.MemorySpace.SMEM)],
        out_specs=vspec((B, CO * HW)),
        compiler_params=pltpu.CompilerParams(dimension_semantics=("arbitrary",)),
    )(x2, fre, fim, wre, wim, gre, gim, bias_vec)
    return out2.reshape(B, CO, HOUT, WOUT)           # contiguous reshape (free)


# ------------------- deterministic SHT basis precompute ---------------------
def _assoc_legendre(nodes, lmax, mmax):
    """Orthonormal associated Legendre P~_l^m(x) on [-1,1]; shape (mmax, lmax, H)."""
    h = nodes.shape[0]
    x = nodes
    s = np.sqrt(np.maximum(1.0 - x * x, 0.0))
    P = np.zeros((mmax, lmax, h), dtype=np.float64)
    pmm = np.full(h, np.sqrt(0.5))
    for m in range(mmax):
        if m > 0:
            pmm = -np.sqrt((2 * m + 1) / (2 * m)) * s * pmm
        if m < lmax:
            P[m, m] = pmm
        if m + 1 < lmax:
            P[m, m + 1] = np.sqrt(2 * m + 3) * x * pmm
        for l in range(m + 2, lmax):
            a = np.sqrt((4 * l * l - 1) / (l * l - m * m))
            b = np.sqrt(((l - 1) ** 2 - m * m) / (4 * (l - 1) ** 2 - 1))
            P[m, l] = a * (x * P[m, l - 1] - b * P[m, l - 2])
    return P


def build_sht_matrices():
    """Unfolded transform matrices (numpy f64); also used by the JAX reference."""
    nodes, wts = np.polynomial.legendre.leggauss(H)            # Legendre-Gauss grid
    P = _assoc_legendre(nodes, L, M)                           # (M, L, H)
    pct_fwd = np.transpose(P * wts[None, None, :], (0, 2, 1))  # (M, H, L) analysis
    pct_inv = P                                                # (M, L, Hout) synthesis

    w_idx = np.arange(W)
    m_idx = np.arange(M)
    ang = 2.0 * np.pi * np.outer(w_idx, m_idx) / W             # (W, M)
    dft_re = np.cos(ang) * (2.0 * np.pi / W)
    dft_im = -np.sin(ang) * (2.0 * np.pi / W)

    c = np.where(m_idx == 0, 1.0, 2.0)[:, None]
    ang_o = 2.0 * np.pi * np.outer(m_idx, np.arange(WOUT)) / WOUT   # (M, Wout)
    idft_re = np.cos(ang_o) * c / (2.0 * np.pi)
    idft_im = np.sin(ang_o) * c / (2.0 * np.pi)
    return dft_re, dft_im, pct_fwd, pct_inv, idft_re, idft_im


def fold_operators(mats, w_re, w_im, bias):
    """Init-time folding of the transform chain into kernel-friendly layouts."""
    dft_re, dft_im, pct_fwd, pct_inv, idft_re, idft_im = mats
    # Analysis: F[(h,w),(l,m)] = dft[w,m] * pct_fwd[m,h,l]
    F_re = np.einsum("wm,mhl->hwlm", dft_re, pct_fwd).reshape(HW, LM)
    F_im = np.einsum("wm,mhl->hwlm", dft_im, pct_fwd).reshape(HW, LM)
    # Synthesis: G[(l,m),(h,w)] = pct_inv[m,l,h] * idft[m,w]
    G_re = np.einsum("mlh,mw->lmhw", pct_inv, idft_re).reshape(LM, HW)
    G_im = np.einsum("mlh,mw->lmhw", pct_inv, idft_im).reshape(LM, HW)

    to = lambda a: jnp.asarray(a, dtype=jnp.float32)
    wre = to(w_re).reshape(CI * CO, 1, LM)       # row index = i*CO + o
    wim = to(w_im).reshape(CI * CO, 1, LM)
    bias_vec = to(bias).reshape(CO)              # SMEM scalars
    return to(F_re), to(F_im), wre, wim, to(G_re), to(G_im), bias_vec


# ----------------------------- pure-JAX reference ---------------------------
def reference(x, mats, w_re, w_im, bias):
    dft_re, dft_im, pct_fwd, pct_inv, idft_re, idft_im = mats
    Xre = jnp.einsum("bchw,wm->bchm", x, dft_re)
    Xim = jnp.einsum("bchw,wm->bchm", x, dft_im)
    Yre = jnp.einsum("bchm,mhl->bclm", Xre, pct_fwd)
    Yim = jnp.einsum("bchm,mhl->bclm", Xim, pct_fwd)
    Zre = jnp.einsum("bilm,iolm->bolm", Yre, w_re) - jnp.einsum("bilm,iolm->bolm", Yim, w_im)
    Zim = jnp.einsum("bilm,iolm->bolm", Yre, w_im) + jnp.einsum("bilm,iolm->bolm", Yim, w_re)
    Ure = jnp.einsum("bolm,mlh->bohm", Zre, pct_inv)
    Uim = jnp.einsum("bolm,mlh->bohm", Zim, pct_inv)
    out = jnp.einsum("bohm,mw->bohw", Ure, idft_re) - jnp.einsum("bohm,mw->bohw", Uim, idft_im)
    return out + bias


if __name__ == "__main__":
    key = jax.random.PRNGKey(0)
    kx, kwr, kwi, kb = jax.random.split(key, 4)

    x = jax.random.normal(kx, (B, CI, H, W), dtype=jnp.float32)

    # Parameters of the mother (joint) SphericalConv; SubConv picks slice INDICES.
    init_std = (2.0 / (CI + CO)) ** 0.5
    w_re_all = init_std * jax.random.normal(kwr, (N_LAYERS, CI, CO, L, M), dtype=jnp.float32)
    w_im_all = init_std * jax.random.normal(kwi, (N_LAYERS, CI, CO, L, M), dtype=jnp.float32)
    bias_all = init_std * jax.random.normal(kb, (N_LAYERS, CO, 1, 1), dtype=jnp.float32)

    w_re = w_re_all[INDICES]
    w_im = w_im_all[INDICES]
    bias = bias_all[INDICES][None]            # (1, CO, 1, 1)

    mats_np = build_sht_matrices()
    mats_j = tuple(jnp.asarray(m, dtype=jnp.float32) for m in mats_np)
    fre, fim, wre, wim, gre, gim, bias_vec = fold_operators(mats_np, w_re, w_im, bias)

    fwd = jax.jit(subconv_forward)
    out = fwd(x, fre, fim, wre, wim, gre, gim, bias_vec)
    out = jax.block_until_ready(out)

    ref = jax.block_until_ready(reference(x, mats_j, w_re, w_im, bias))
    assert out.shape == (B, CO, HOUT, WOUT)
    assert jnp.allclose(out, ref, rtol=5e-2, atol=5e-2), "mismatch vs JAX reference"

    print("KERNEL_OK")
</pallas_src>

<mosaic_0001>
module attributes {stable_mosaic.version = 11 : i64} {
  func.func @_subconv_kernel(%arg0: i32, %arg1: memref<2x1024xf32, #tpu.memory_space<vmem>>, %arg2: memref<256x64xf32, #tpu.memory_space<vmem>>, %arg3: memref<256x64xf32, #tpu.memory_space<vmem>>, %arg4: memref<16x1x64xf32, #tpu.memory_space<vmem>>, %arg5: memref<16x1x64xf32, #tpu.memory_space<vmem>>, %arg6: memref<64x256xf32, #tpu.memory_space<vmem>>, %arg7: memref<64x256xf32, #tpu.memory_space<vmem>>, %arg8: memref<4xf32, #tpu.memory_space<smem>>, %arg9: memref<2x1024xf32, #tpu.memory_space<vmem>>) attributes {dimension_semantics = [#tpu.dimension_semantics<arbitrary>], iteration_bounds = array<i64: 1>, scalar_prefetch = 0 : i64, scratch_operands = 0 : i64, tpu.core_type = #tpu.core_type<tc>, window_params = [{pipeline_mode = #tpu.pipeline_mode<synchronous>, transform_indices = @transform_0, window_bounds = array<i64: 2, 1024>}, {pipeline_mode = #tpu.pipeline_mode<synchronous>, transform_indices = @transform_1, window_bounds = array<i64: 256, 64>}, {pipeline_mode = #tpu.pipeline_mode<synchronous>, transform_indices = @transform_2, window_bounds = array<i64: 256, 64>}, {pipeline_mode = #tpu.pipeline_mode<synchronous>, transform_indices = @transform_3, window_bounds = array<i64: 16, 1, 64>}, {pipeline_mode = #tpu.pipeline_mode<synchronous>, transform_indices = @transform_4, window_bounds = array<i64: 16, 1, 64>}, {pipeline_mode = #tpu.pipeline_mode<synchronous>, transform_indices = @transform_5, window_bounds = array<i64: 64, 256>}, {pipeline_mode = #tpu.pipeline_mode<synchronous>, transform_indices = @transform_6, window_bounds = array<i64: 64, 256>}, {transform_indices = @transform_7, window_bounds = array<i64: 4>}, {pipeline_mode = #tpu.pipeline_mode<synchronous>, transform_indices = @transform_8, window_bounds = array<i64: 2, 1024>}]} {
    %c0 = arith.constant 0 : index
    %c0_0 = arith.constant 0 : index
    %0 = vector.load %arg1[%c0, %c0_0] : memref<2x1024xf32, #tpu.memory_space<vmem>>, vector<2x256xf32>
    %c0_1 = arith.constant 0 : index
    %c0_2 = arith.constant 0 : index
    %1 = vector.load %arg2[%c0_1, %c0_2] : memref<256x64xf32, #tpu.memory_space<vmem>>, vector<256x64xf32>
    %cst = arith.constant dense<0.000000e+00> : vector<2x64xf32>
    %2 = tpu.matmul %0, %1, %cst {dimension_numbers = #tpu.dot_dimension_numbers<[1], [0], [0], [1], [0, 0, 1, 1], [], []>} : vector<2x256xf32>, vector<256x64xf32>, vector<2x64xf32> -> vector<2x64xf32>
    %c0_3 = arith.constant 0 : index
    %c0_4 = arith.constant 0 : index
    %3 = vector.load %arg3[%c0_3, %c0_4] : memref<256x64xf32, #tpu.memory_space<vmem>>, vector<256x64xf32>
    %cst_5 = arith.constant dense<0.000000e+00> : vector<2x64xf32>
    %4 = tpu.matmul %0, %3, %cst_5 {dimension_numbers = #tpu.dot_dimension_numbers<[1], [0], [0], [1], [0, 0, 1, 1], [], []>} : vector<2x256xf32>, vector<256x64xf32>, vector<2x64xf32> -> vector<2x64xf32>
    %c0_6 = arith.constant 0 : index
    %c256 = arith.constant 256 : index
    %5 = vector.load %arg1[%c0_6, %c256] : memref<2x1024xf32, #tpu.memory_space<vmem>>, vector<2x256xf32>
    %c0_7 = arith.constant 0 : index
    %c0_8 = arith.constant 0 : index
    %6 = vector.load %arg2[%c0_7, %c0_8] : memref<256x64xf32, #tpu.memory_space<vmem>>, vector<256x64xf32>
    %cst_9 = arith.constant dense<0.000000e+00> : vector<2x64xf32>
    %7 = tpu.matmul %5, %6, %cst_9 {dimension_numbers = #tpu.dot_dimension_numbers<[1], [0], [0], [1], [0, 0, 1, 1], [], []>} : vector<2x256xf32>, vector<256x64xf32>, vector<2x64xf32> -> vector<2x64xf32>
    %c0_10 = arith.constant 0 : index
    %c0_11 = arith.constant 0 : index
    %8 = vector.load %arg3[%c0_10, %c0_11] : memref<256x64xf32, #tpu.memory_space<vmem>>, vector<256x64xf32>
    %cst_12 = arith.constant dense<0.000000e+00> : vector<2x64xf32>
    %9 = tpu.matmul %5, %8, %cst_12 {dimension_numbers = #tpu.dot_dimension_numbers<[1], [0], [0], [1], [0, 0, 1, 1], [], []>} : vector<2x256xf32>, vector<256x64xf32>, vector<2x64xf32> -> vector<2x64xf32>
    %c0_13 = arith.constant 0 : index
    %c512 = arith.constant 512 : index
    %10 = vector.load %arg1[%c0_13, %c512] : memref<2x1024xf32, #tpu.memory_space<vmem>>, vector<2x256xf32>
    %c0_14 = arith.constant 0 : index
    %c0_15 = arith.constant 0 : index
    %11 = vector.load %arg2[%c0_14, %c0_15] : memref<256x64xf32, #tpu.memory_space<vmem>>, vector<256x64xf32>
    %cst_16 = arith.constant dense<0.000000e+00> : vector<2x64xf32>
    %12 = tpu.matmul %10, %11, %cst_16 {dimension_numbers = #tpu.dot_dimension_numbers<[1], [0], [0], [1], [0, 0, 1, 1], [], []>} : vector<2x256xf32>, vector<256x64xf32>, vector<2x64xf32> -> vector<2x64xf32>
    %c0_17 = arith.constant 0 : index
    %c0_18 = arith.constant 0 : index
    %13 = vector.load %arg3[%c0_17, %c0_18] : memref<256x64xf32, #tpu.memory_space<vmem>>, vector<256x64xf32>
    %cst_19 = arith.constant dense<0.000000e+00> : vector<2x64xf32>
    %14 = tpu.matmul %10, %13, %cst_19 {dimension_numbers = #tpu.dot_dimension_numbers<[1], [0], [0], [1], [0, 0, 1, 1], [], []>} : vector<2x256xf32>, vector<256x64xf32>, vector<2x64xf32> -> vector<2x64xf32>
    %c0_20 = arith.constant 0 : index
    %c768 = arith.constant 768 : index
    %15 = vector.load %arg1[%c0_20, %c768] : memref<2x1024xf32, #tpu.memory_space<vmem>>, vector<2x256xf32>
    %c0_21 = arith.constant 0 : index
    %c0_22 = arith.constant 0 : index
    %16 = vector.load %arg2[%c0_21, %c0_22] : memref<256x64xf32, #tpu.memory_space<vmem>>, vector<256x64xf32>
    %cst_23 = arith.constant dense<0.000000e+00> : vector<2x64xf32>
    %17 = tpu.matmul %15, %16, %cst_23 {dimension_numbers = #tpu.dot_dimension_numbers<[1], [0], [0], [1], [0, 0, 1, 1], [], []>} : vector<2x256xf32>, vector<256x64xf32>, vector<2x64xf32> -> vector<2x64xf32>
    %c0_24 = arith.constant 0 : index
    %c0_25 = arith.constant 0 : index
    %18 = vector.load %arg3[%c0_24, %c0_25] : memref<256x64xf32, #tpu.memory_space<vmem>>, vector<256x64xf32>
    %cst_26 = arith.constant dense<0.000000e+00> : vector<2x64xf32>
    %19 = tpu.matmul %15, %18, %cst_26 {dimension_numbers = #tpu.dot_dimension_numbers<[1], [0], [0], [1], [0, 0, 1, 1], [], []>} : vector<2x256xf32>, vector<256x64xf32>, vector<2x64xf32> -> vector<2x64xf32>
    %c0_27 = arith.constant 0 : index
    %c0_28 = arith.constant 0 : index
    %c0_29 = arith.constant 0 : index
    %20 = vector.load %arg4[%c0_27, %c0_28, %c0_29] : memref<16x1x64xf32, #tpu.memory_space<vmem>>, vector<1x1x64xf32>
    %21 = vector.shape_cast %20 : vector<1x1x64xf32> to vector<1x64xf32>
    %c0_30 = arith.constant 0 : index
    %c0_31 = arith.constant 0 : index
    %c0_32 = arith.constant 0 : index
    %22 = vector.load %arg5[%c0_30, %c0_31, %c0_32] : memref<16x1x64xf32, #tpu.memory_space<vmem>>, vector<1x1x64xf32>
    %23 = vector.shape_cast %22 : vector<1x1x64xf32> to vector<1x64xf32>
    %24 = vector.broadcast %21 : vector<1x64xf32> to vector<2x64xf32>
    %25 = arith.mulf %2, %24 : vector<2x64xf32>
    %26 = vector.broadcast %23 : vector<1x64xf32> to vector<2x64xf32>
    %27 = arith.mulf %4, %26 : vector<2x64xf32>
    %28 = arith.addf %2, %4 : vector<2x64xf32>
    %29 = arith.addf %21, %23 : vector<1x64xf32>
    %30 = vector.broadcast %29 : vector<1x64xf32> to vector<2x64xf32>
    %31 = arith.mulf %28, %30 : vector<2x64xf32>
    %32 = arith.subf %25, %27 : vector<2x64xf32>
    %33 = arith.subf %31, %25 : vector<2x64xf32>
    %34 = arith.subf %33, %27 : vector<2x64xf32>
    %c4 = arith.constant 4 : index
    %c0_33 = arith.constant 0 : index
    %c0_34 = arith.constant 0 : index
    %35 = vector.load %arg4[%c4, %c0_33, %c0_34] : memref<16x1x64xf32, #tpu.memory_space<vmem>>, vector<1x1x64xf32>
    %36 = vector.shape_cast %35 : vector<1x1x64xf32> to vector<1x64xf32>
    %c4_35 = arith.constant 4 : index
    %c0_36 = arith.constant 0 : index
    %c0_37 = arith.constant 0 : index
    %37 = vector.load %arg5[%c4_35, %c0_36, %c0_37] : memref<16x1x64xf32, #tpu.memory_space<vmem>>, vector<1x1x64xf32>
    %38 = vector.shape_cast %37 : vector<1x1x64xf32> to vector<1x64xf32>
    %39 = vector.broadcast %36 : vector<1x64xf32> to vector<2x64xf32>
    %40 = arith.mulf %7, %39 : vector<2x64xf32>
    %41 = vector.broadcast %38 : vector<1x64xf32> to vector<2x64xf32>
    %42 = arith.mulf %9, %41 : vector<2x64xf32>
    %43 = arith.addf %7, %9 : vector<2x64xf32>
    %44 = arith.addf %36, %38 : vector<1x64xf32>
    %45 = vector.broadcast %44 : vector<1x64xf32> to vector<2x64xf32>
    %46 = arith.mulf %43, %45 : vector<2x64xf32>
    %47 = arith.subf %40, %42 : vector<2x64xf32>
    %48 = arith.subf %46, %40 : vector<2x64xf32>
    %49 = arith.subf %48, %42 : vector<2x64xf32>
    %50 = arith.addf %32, %47 : vector<2x64xf32>
    %51 = arith.addf %34, %49 : vector<2x64xf32>
    %c8 = arith.constant 8 : index
    %c0_38 = arith.constant 0 : index
    %c0_39 = arith.constant 0 : index
    %52 = vector.load %arg4[%c8, %c0_38, %c0_39] : memref<16x1x64xf32, #tpu.memory_space<vmem>>, vector<1x1x64xf32>
    %53 = vector.shape_cast %52 : vector<1x1x64xf32> to vector<1x64xf32>
    %c8_40 = arith.constant 8 : index
    %c0_41 = arith.constant 0 : index
    %c0_42 = arith.constant 0 : index
    %54 = vector.load %arg5[%c8_40, %c0_41, %c0_42] : memref<16x1x64xf32, #tpu.memory_space<vmem>>, vector<1x1x64xf32>
    %55 = vector.shape_cast %54 : vector<1x1x64xf32> to vector<1x64xf32>
    %56 = vector.broadcast %53 : vector<1x64xf32> to vector<2x64xf32>
    %57 = arith.mulf %12, %56 : vector<2x64xf32>
    %58 = vector.broadcast %55 : vector<1x64xf32> to vector<2x64xf32>
    %59 = arith.mulf %14, %58 : vector<2x64xf32>
    %60 = arith.addf %12, %14 : vector<2x64xf32>
    %61 = arith.addf %53, %55 : vector<1x64xf32>
    %62 = vector.broadcast %61 : vector<1x64xf32> to vector<2x64xf32>
    %63 = arith.mulf %60, %62 : vector<2x64xf32>
    %64 = arith.subf %57, %59 : vector<2x64xf32>
    %65 = arith.subf %63, %57 : vector<2x64xf32>
    %66 = arith.subf %65, %59 : vector<2x64xf32>
    %67 = arith.addf %50, %64 : vector<2x64xf32>
    %68 = arith.addf %51, %66 : vector<2x64xf32>
    %c12 = arith.constant 12 : index
    %c0_43 = arith.constant 0 : index
    %c0_44 = arith.constant 0 : index
    %69 = vector.load %arg4[%c12, %c0_43, %c0_44] : memref<16x1x64xf32, #tpu.memory_space<vmem>>, vector<1x1x64xf32>
    %70 = vector.shape_cast %69 : vector<1x1x64xf32> to vector<1x64xf32>
    %c12_45 = arith.constant 12 : index
    %c0_46 = arith.constant 0 : index
    %c0_47 = arith.constant 0 : index
    %71 = vector.load %arg5[%c12_45, %c0_46, %c0_47] : memref<16x1x64xf32, #tpu.memory_space<vmem>>, vector<1x1x64xf32>
    %72 = vector.shape_cast %71 : vector<1x1x64xf32> to vector<1x64xf32>
    %73 = vector.broadcast %70 : vector<1x64xf32> to vector<2x64xf32>
    %74 = arith.mulf %17, %73 : vector<2x64xf32>
    %75 = vector.broadcast %72 : vector<1x64xf32> to vector<2x64xf32>
    %76 = arith.mulf %19, %75 : vector<2x64xf32>
    %77 = arith.addf %17, %19 : vector<2x64xf32>
    %78 = arith.addf %70, %72 : vector<1x64xf32>
    %79 = vector.broadcast %78 : vector<1x64xf32> to vector<2x64xf32>
    %80 = arith.mulf %77, %79 : vector<2x64xf32>
    %81 = arith.subf %74, %76 : vector<2x64xf32>
    %82 = arith.subf %80, %74 : vector<2x64xf32>
    %83 = arith.subf %82, %76 : vector<2x64xf32>
    %84 = arith.addf %67, %81 : vector<2x64xf32>
    %85 = arith.addf %68, %83 : vector<2x64xf32>
    %c0_48 = arith.constant 0 : index
    %c0_49 = arith.constant 0 : index
    %86 = vector.load %arg6[%c0_48, %c0_49] : memref<64x256xf32, #tpu.memory_space<vmem>>, vector<64x256xf32>
    %cst_50 = arith.constant dense<0.000000e+00> : vector<2x256xf32>
    %87 = tpu.matmul %84, %86, %cst_50 {dimension_numbers = #tpu.dot_dimension_numbers<[1], [0], [0], [1], [0, 0, 1, 1], [], []>} : vector<2x64xf32>, vector<64x256xf32>, vector<2x256xf32> -> vector<2x256xf32>
    %c0_51 = arith.constant 0 : index
    %c0_52 = arith.constant 0 : index
    %88 = vector.load %arg7[%c0_51, %c0_52] : memref<64x256xf32, #tpu.memory_space<vmem>>, vector<64x256xf32>
    %cst_53 = arith.constant dense<0.000000e+00> : vector<2x256xf32>
    %89 = tpu.matmul %85, %88, %cst_53 {dimension_numbers = #tpu.dot_dimension_numbers<[1], [0], [0], [1], [0, 0, 1, 1], [], []>} : vector<2x64xf32>, vector<64x256xf32>, vector<2x256xf32> -> vector<2x256xf32>
    %90 = arith.subf %87, %89 : vector<2x256xf32>
    %c0_54 = arith.constant 0 : index
    %91 = memref.load %arg8[%c0_54] : memref<4xf32, #tpu.memory_space<smem>>
    %92 = vector.broadcast %91 : f32 to vector<2x256xf32>
    %93 = arith.addf %90, %92 : vector<2x256xf32>
    %c0_55 = arith.constant 0 : index
    %c0_56 = arith.constant 0 : index
    %94 = vector.load %arg9[%c0_55, %c0_56] : memref<2x1024xf32, #tpu.memory_space<vmem>>, vector<2x256xf32>
    tpu.vector_store %arg9[%c0_55, %c0_56], %93 {strides = array<i32>} : memref<2x1024xf32, #tpu.memory_space<vmem>>, vector<2x256xf32>,
    %c1 = arith.constant 1 : index
    %c0_57 = arith.constant 0 : index
    %c0_58 = arith.constant 0 : index
    %95 = vector.load %arg4[%c1, %c0_57, %c0_58] : memref<16x1x64xf32, #tpu.memory_space<vmem>>, vector<1x1x64xf32>
    %96 = vector.shape_cast %95 : vector<1x1x64xf32> to vector<1x64xf32>
    %c1_59 = arith.constant 1 : index
    %c0_60 = arith.constant 0 : index
    %c0_61 = arith.constant 0 : index
    %97 = vector.load %arg5[%c1_59, %c0_60, %c0_61] : memref<16x1x64xf32, #tpu.memory_space<vmem>>, vector<1x1x64xf32>
    %98 = vector.shape_cast %97 : vector<1x1x64xf32> to vector<1x64xf32>
    %99 = vector.broadcast %96 : vector<1x64xf32> to vector<2x64xf32>
    %100 = arith.mulf %2, %99 : vector<2x64xf32>
    %101 = vector.broadcast %98 : vector<1x64xf32> to vector<2x64xf32>
    %102 = arith.mulf %4, %101 : vector<2x64xf32>
    %103 = arith.addf %2, %4 : vector<2x64xf32>
    %104 = arith.addf %96, %98 : vector<1x64xf32>
    %105 = vector.broadcast %104 : vector<1x64xf32> to vector<2x64xf32>
    %106 = arith.mulf %103, %105 : vector<2x64xf32>
    %107 = arith.subf %100, %102 : vector<2x64xf32>
    %108 = arith.subf %106, %100 : vector<2x64xf32>
    %109 = arith.subf %108, %102 : vector<2x64xf32>
    %c5 = arith.constant 5 : index
    %c0_62 = arith.constant 0 : index
    %c0_63 = arith.constant 0 : index
    %110 = vector.load %arg4[%c5, %c0_62, %c0_63] : memref<16x1x64xf32, #tpu.memory_space<vmem>>, vector<1x1x64xf32>
    %111 = vector.shape_cast %110 : vector<1x1x64xf32> to vector<1x64xf32>
    %c5_64 = arith.constant 5 : index
    %c0_65 = arith.constant 0 : index
    %c0_66 = arith.constant 0 : index
    %112 = vector.load %arg5[%c5_64, %c0_65, %c0_66] : memref<16x1x64xf32, #tpu.memory_space<vmem>>, vector<1x1x64xf32>
    %113 = vector.shape_cast %112 : vector<1x1x64xf32> to vector<1x64xf32>
    %114 = vector.broadcast %111 : vector<1x64xf32> to vector<2x64xf32>
    %115 = arith.mulf %7, %114 : vector<2x64xf32>
    %116 = vector.broadcast %113 : vector<1x64xf32> to vector<2x64xf32>
    %117 = arith.mulf %9, %116 : vector<2x64xf32>
    %118 = arith.addf %7, %9 : vector<2x64xf32>
    %119 = arith.addf %111, %113 : vector<1x64xf32>
    %120 = vector.broadcast %119 : vector<1x64xf32> to vector<2x64xf32>
    %121 = arith.mulf %118, %120 : vector<2x64xf32>
    %122 = arith.subf %115, %117 : vector<2x64xf32>
    %123 = arith.subf %121, %115 : vector<2x64xf32>
    %124 = arith.subf %123, %117 : vector<2x64xf32>
    %125 = arith.addf %107, %122 : vector<2x64xf32>
    %126 = arith.addf %109, %124 : vector<2x64xf32>
    %c9 = arith.constant 9 : index
    %c0_67 = arith.constant 0 : index
    %c0_68 = arith.constant 0 : index
    %127 = vector.load %arg4[%c9, %c0_67, %c0_68] : memref<16x1x64xf32, #tpu.memory_space<vmem>>, vector<1x1x64xf32>
    %128 = vector.shape_cast %127 : vector<1x1x64xf32> to vector<1x64xf32>
    %c9_69 = arith.constant 9 : index
    %c0_70 = arith.constant 0 : index
    %c0_71 = arith.constant 0 : index
    %129 = vector.load %arg5[%c9_69, %c0_70, %c0_71] : memref<16x1x64xf32, #tpu.memory_space<vmem>>, vector<1x1x64xf32>
    %130 = vector.shape_cast %129 : vector<1x1x64xf32> to vector<1x64xf32>
    %131 = vector.broadcast %128 : vector<1x64xf32> to vector<2x64xf32>
    %132 = arith.mulf %12, %131 : vector<2x64xf32>
    %133 = vector.broadcast %130 : vector<1x64xf32> to vector<2x64xf32>
    %134 = arith.mulf %14, %133 : vector<2x64xf32>
    %135 = arith.addf %12, %14 : vector<2x64xf32>
    %136 = arith.addf %128, %130 : vector<1x64xf32>
    %137 = vector.broadcast %136 : vector<1x64xf32> to vector<2x64xf32>
    %138 = arith.mulf %135, %137 : vector<2x64xf32>
    %139 = arith.subf %132, %134 : vector<2x64xf32>
    %140 = arith.subf %138, %132 : vector<2x64xf32>
    %141 = arith.subf %140, %134 : vector<2x64xf32>
    %142 = arith.addf %125, %139 : vector<2x64xf32>
    %143 = arith.addf %126, %141 : vector<2x64xf32>
    %c13 = arith.constant 13 : index
    %c0_72 = arith.constant 0 : index
    %c0_73 = arith.constant 0 : index
    %144 = vector.load %arg4[%c13, %c0_72, %c0_73] : memref<16x1x64xf32, #tpu.memory_space<vmem>>, vector<1x1x64xf32>
    %145 = vector.shape_cast %144 : vector<1x1x64xf32> to vector<1x64xf32>
    %c13_74 = arith.constant 13 : index
    %c0_75 = arith.constant 0 : index
    %c0_76 = arith.constant 0 : index
    %146 = vector.load %arg5[%c13_74, %c0_75, %c0_76] : memref<16x1x64xf32, #tpu.memory_space<vmem>>, vector<1x1x64xf32>
    %147 = vector.shape_cast %146 : vector<1x1x64xf32> to vector<1x64xf32>
    %148 = vector.broadcast %145 : vector<1x64xf32> to vector<2x64xf32>
    %149 = arith.mulf %17, %148 : vector<2x64xf32>
    %150 = vector.broadcast %147 : vector<1x64xf32> to vector<2x64xf32>
    %151 = arith.mulf %19, %150 : vector<2x64xf32>
    %152 = arith.addf %17, %19 : vector<2x64xf32>
    %153 = arith.addf %145, %147 : vector<1x64xf32>
    %154 = vector.broadcast %153 : vector<1x64xf32> to vector<2x64xf32>
    %155 = arith.mulf %152, %154 : vector<2x64xf32>
    %156 = arith.subf %149, %151 : vector<2x64xf32>
    %157 = arith.subf %155, %149 : vector<2x64xf32>
    %158 = arith.subf %157, %151 : vector<2x64xf32>
    %159 = arith.addf %142, %156 : vector<2x64xf32>
    %160 = arith.addf %143, %158 : vector<2x64xf32>
    %c0_77 = arith.constant 0 : index
    %c0_78 = arith.constant 0 : index
    %161 = vector.load %arg6[%c0_77, %c0_78] : memref<64x256xf32, #tpu.memory_space<vmem>>, vector<64x256xf32>
    %cst_79 = arith.constant dense<0.000000e+00> : vector<2x256xf32>
    %162 = tpu.matmul %159, %161, %cst_79 {dimension_numbers = #tpu.dot_dimension_numbers<[1], [0], [0], [1], [0, 0, 1, 1], [], []>} : vector<2x64xf32>, vector<64x256xf32>, vector<2x256xf32> -> vector<2x256xf32>
    %c0_80 = arith.constant 0 : index
    %c0_81 = arith.constant 0 : index
    %163 = vector.load %arg7[%c0_80, %c0_81] : memref<64x256xf32, #tpu.memory_space<vmem>>, vector<64x256xf32>
    %cst_82 = arith.constant dense<0.000000e+00> : vector<2x256xf32>
    %164 = tpu.matmul %160, %163, %cst_82 {dimension_numbers = #tpu.dot_dimension_numbers<[1], [0], [0], [1], [0, 0, 1, 1], [], []>} : vector<2x64xf32>, vector<64x256xf32>, vector<2x256xf32> -> vector<2x256xf32>
    %165 = arith.subf %162, %164 : vector<2x256xf32>
    %c1_83 = arith.constant 1 : index
    %166 = memref.load %arg8[%c1_83] : memref<4xf32, #tpu.memory_space<smem>>
    %167 = vector.broadcast %166 : f32 to vector<2x256xf32>
    %168 = arith.addf %165, %167 : vector<2x256xf32>
    %c0_84 = arith.constant 0 : index
    %c256_85 = arith.constant 256 : index
    %169 = vector.load %arg9[%c0_84, %c256_85] : memref<2x1024xf32, #tpu.memory_space<vmem>>, vector<2x256xf32>
    tpu.vector_store %arg9[%c0_84, %c256_85], %168 {strides = array<i32>} : memref<2x1024xf32, #tpu.memory_space<vmem>>, vector<2x256xf32>,
    %c2 = arith.constant 2 : index
    %c0_86 = arith.constant 0 : index
    %c0_87 = arith.constant 0 : index
    %170 = vector.load %arg4[%c2, %c0_86, %c0_87] : memref<16x1x64xf32, #tpu.memory_space<vmem>>, vector<1x1x64xf32>
    %171 = vector.shape_cast %170 : vector<1x1x64xf32> to vector<1x64xf32>
    %c2_88 = arith.constant 2 : index
    %c0_89 = arith.constant 0 : index
    %c0_90 = arith.constant 0 : index
    %172 = vector.load %arg5[%c2_88, %c0_89, %c0_90] : memref<16x1x64xf32, #tpu.memory_space<vmem>>, vector<1x1x64xf32>
    %173 = vector.shape_cast %172 : vector<1x1x64xf32> to vector<1x64xf32>
    %174 = vector.broadcast %171 : vector<1x64xf32> to vector<2x64xf32>
    %175 = arith.mulf %2, %174 : vector<2x64xf32>
    %176 = vector.broadcast %173 : vector<1x64xf32> to vector<2x64xf32>
    %177 = arith.mulf %4, %176 : vector<2x64xf32>
    %178 = arith.addf %2, %4 : vector<2x64xf32>
    %179 = arith.addf %171, %173 : vector<1x64xf32>
    %180 = vector.broadcast %179 : vector<1x64xf32> to vector<2x64xf32>
    %181 = arith.mulf %178, %180 : vector<2x64xf32>
    %182 = arith.subf %175, %177 : vector<2x64xf32>
    %183 = arith.subf %181, %175 : vector<2x64xf32>
    %184 = arith.subf %183, %177 : vector<2x64xf32>
    %c6 = arith.constant 6 : index
    %c0_91 = arith.constant 0 : index
    %c0_92 = arith.constant 0 : index
    %185 = vector.load %arg4[%c6, %c0_91, %c0_92] : memref<16x1x64xf32, #tpu.memory_space<vmem>>, vector<1x1x64xf32>
    %186 = vector.shape_cast %185 : vector<1x1x64xf32> to vector<1x64xf32>
    %c6_93 = arith.constant 6 : index
    %c0_94 = arith.constant 0 : index
    %c0_95 = arith.constant 0 : index
    %187 = vector.load %arg5[%c6_93, %c0_94, %c0_95] : memref<16x1x64xf32, #tpu.memory_space<vmem>>, vector<1x1x64xf32>
    %188 = vector.shape_cast %187 : vector<1x1x64xf32> to vector<1x64xf32>
    %189 = vector.broadcast %186 : vector<1x64xf32> to vector<2x64xf32>
    %190 = arith.mulf %7, %189 : vector<2x64xf32>
    %191 = vector.broadcast %188 : vector<1x64xf32> to vector<2x64xf32>
    %192 = arith.mulf %9, %191 : vector<2x64xf32>
    %193 = arith.addf %7, %9 : vector<2x64xf32>
    %194 = arith.addf %186, %188 : vector<1x64xf32>
    %195 = vector.broadcast %194 : vector<1x64xf32> to vector<2x64xf32>
    %196 = arith.mulf %193, %195 : vector<2x64xf32>
    %197 = arith.subf %190, %192 : vector<2x64xf32>
    %198 = arith.subf %196, %190 : vector<2x64xf32>
    %199 = arith.subf %198, %192 : vector<2x64xf32>
    %200 = arith.addf %182, %197 : vector<2x64xf32>
    %201 = arith.addf %184, %199 : vector<2x64xf32>
    %c10 = arith.constant 10 : index
    %c0_96 = arith.constant 0 : index
    %c0_97 = arith.constant 0 : index
    %202 = vector.load %arg4[%c10, %c0_96, %c0_97] : memref<16x1x64xf32, #tpu.memory_space<vmem>>, vector<1x1x64xf32>
    %203 = vector.shape_cast %202 : vector<1x1x64xf32> to vector<1x64xf32>
    %c10_98 = arith.constant 10 : index
    %c0_99 = arith.constant 0 : index
    %c0_100 = arith.constant 0 : index
    %204 = vector.load %arg5[%c10_98, %c0_99, %c0_100] : memref<16x1x64xf32, #tpu.memory_space<vmem>>, vector<1x1x64xf32>
    %205 = vector.shape_cast %204 : vector<1x1x64xf32> to vector<1x64xf32>
    %206 = vector.broadcast %203 : vector<1x64xf32> to vector<2x64xf32>
    %207 = arith.mulf %12, %206 : vector<2x64xf32>
    %208 = vector.broadcast %205 : vector<1x64xf32> to vector<2x64xf32>
    %209 = arith.mulf %14, %208 : vector<2x64xf32>
    %210 = arith.addf %12, %14 : vector<2x64xf32>
    %211 = arith.addf %203, %205 : vector<1x64xf32>
    %212 = vector.broadcast %211 : vector<1x64xf32> to vector<2x64xf32>
    %213 = arith.mulf %210, %212 : vector<2x64xf32>
    %214 = arith.subf %207, %209 : vector<2x64xf32>
    %215 = arith.subf %213, %207 : vector<2x64xf32>
    %216 = arith.subf %215, %209 : vector<2x64xf32>
    %217 = arith.addf %200, %214 : vector<2x64xf32>
    %218 = arith.addf %201, %216 : vector<2x64xf32>
    %c14 = arith.constant 14 : index
    %c0_101 = arith.constant 0 : index
    %c0_102 = arith.constant 0 : index
    %219 = vector.load %arg4[%c14, %c0_101, %c0_102] : memref<16x1x64xf32, #tpu.memory_space<vmem>>, vector<1x1x64xf32>
    %220 = vector.shape_cast %219 : vector<1x1x64xf32> to vector<1x64xf32>
    %c14_103 = arith.constant 14 : index
    %c0_104 = arith.constant 0 : index
    %c0_105 = arith.constant 0 : index
    %221 = vector.load %arg5[%c14_103, %c0_104, %c0_105] : memref<16x1x64xf32, #tpu.memory_space<vmem>>, vector<1x1x64xf32>
    %222 = vector.shape_cast %221 : vector<1x1x64xf32> to vector<1x64xf32>
    %223 = vector.broadcast %220 : vector<1x64xf32> to vector<2x64xf32>
    %224 = arith.mulf %17, %223 : vector<2x64xf32>
    %225 = vector.broadcast %222 : vector<1x64xf32> to vector<2x64xf32>
    %226 = arith.mulf %19, %225 : vector<2x64xf32>
    %227 = arith.addf %17, %19 : vector<2x64xf32>
    %228 = arith.addf %220, %222 : vector<1x64xf32>
    %229 = vector.broadcast %228 : vector<1x64xf32> to vector<2x64xf32>
    %230 = arith.mulf %227, %229 : vector<2x64xf32>
    %231 = arith.subf %224, %226 : vector<2x64xf32>
    %232 = arith.subf %230, %224 : vector<2x64xf32>
    %233 = arith.subf %232, %226 : vector<2x64xf32>
    %234 = arith.addf %217, %231 : vector<2x64xf32>
    %235 = arith.addf %218, %233 : vector<2x64xf32>
    %c0_106 = arith.constant 0 : index
    %c0_107 = arith.constant 0 : index
    %236 = vector.load %arg6[%c0_106, %c0_107] : memref<64x256xf32, #tpu.memory_space<vmem>>, vector<64x256xf32>
    %cst_108 = arith.constant dense<0.000000e+00> : vector<2x256xf32>
    %237 = tpu.matmul %234, %236, %cst_108 {dimension_numbers = #tpu.dot_dimension_numbers<[1], [0], [0], [1], [0, 0, 1, 1], [], []>} : vector<2x64xf32>, vector<64x256xf32>, vector<2x256xf32> -> vector<2x256xf32>
    %c0_109 = arith.constant 0 : index
    %c0_110 = arith.constant 0 : index
    %238 = vector.load %arg7[%c0_109, %c0_110] : memref<64x256xf32, #tpu.memory_space<vmem>>, vector<64x256xf32>
    %cst_111 = arith.constant dense<0.000000e+00> : vector<2x256xf32>
    %239 = tpu.matmul %235, %238, %cst_111 {dimension_numbers = #tpu.dot_dimension_numbers<[1], [0], [0], [1], [0, 0, 1, 1], [], []>} : vector<2x64xf32>, vector<64x256xf32>, vector<2x256xf32> -> vector<2x256xf32>
    %240 = arith.subf %237, %239 : vector<2x256xf32>
    %c2_112 = arith.constant 2 : index
    %241 = memref.load %arg8[%c2_112] : memref<4xf32, #tpu.memory_space<smem>>
    %242 = vector.broadcast %241 : f32 to vector<2x256xf32>
    %243 = arith.addf %240, %242 : vector<2x256xf32>
    %c0_113 = arith.constant 0 : index
    %c512_114 = arith.constant 512 : index
    %244 = vector.load %arg9[%c0_113, %c512_114] : memref<2x1024xf32, #tpu.memory_space<vmem>>, vector<2x256xf32>
    tpu.vector_store %arg9[%c0_113, %c512_114], %243 {strides = array<i32>} : memref<2x1024xf32, #tpu.memory_space<vmem>>, vector<2x256xf32>,
    %c3 = arith.constant 3 : index
    %c0_115 = arith.constant 0 : index
    %c0_116 = arith.constant 0 : index
    %245 = vector.load %arg4[%c3, %c0_115, %c0_116] : memref<16x1x64xf32, #tpu.memory_space<vmem>>, vector<1x1x64xf32>
    %246 = vector.shape_cast %245 : vector<1x1x64xf32> to vector<1x64xf32>
    %c3_117 = arith.constant 3 : index
    %c0_118 = arith.constant 0 : index
    %c0_119 = arith.constant 0 : index
    %247 = vector.load %arg5[%c3_117, %c0_118, %c0_119] : memref<16x1x64xf32, #tpu.memory_space<vmem>>, vector<1x1x64xf32>
    %248 = vector.shape_cast %247 : vector<1x1x64xf32> to vector<1x64xf32>
    %249 = vector.broadcast %246 : vector<1x64xf32> to vector<2x64xf32>
    %250 = arith.mulf %2, %249 : vector<2x64xf32>
    %251 = vector.broadcast %248 : vector<1x64xf32> to vector<2x64xf32>
    %252 = arith.mulf %4, %251 : vector<2x64xf32>
    %253 = arith.addf %2, %4 : vector<2x64xf32>
    %254 = arith.addf %246, %248 : vector<1x64xf32>
    %255 = vector.broadcast %254 : vector<1x64xf32> to vector<2x64xf32>
    %256 = arith.mulf %253, %255 : vector<2x64xf32>
    %257 = arith.subf %250, %252 : vector<2x64xf32>
    %258 = arith.subf %256, %250 : vector<2x64xf32>
    %259 = arith.subf %258, %252 : vector<2x64xf32>
    %c7 = arith.constant 7 : index
    %c0_120 = arith.constant 0 : index
    %c0_121 = arith.constant 0 : index
    %260 = vector.load %arg4[%c7, %c0_120, %c0_121] : memref<16x1x64xf32, #tpu.memory_space<vmem>>, vector<1x1x64xf32>
    %261 = vector.shape_cast %260 : vector<1x1x64xf32> to vector<1x64xf32>
    %c7_122 = arith.constant 7 : index
    %c0_123 = arith.constant 0 : index
    %c0_124 = arith.constant 0 : index
    %262 = vector.load %arg5[%c7_122, %c0_123, %c0_124] : memref<16x1x64xf32, #tpu.memory_space<vmem>>, vector<1x1x64xf32>
    %263 = vector.shape_cast %262 : vector<1x1x64xf32> to vector<1x64xf32>
    %264 = vector.broadcast %261 : vector<1x64xf32> to vector<2x64xf32>
    %265 = arith.mulf %7, %264 : vector<2x64xf32>
    %266 = vector.broadcast %263 : vector<1x64xf32> to vector<2x64xf32>
    %267 = arith.mulf %9, %266 : vector<2x64xf32>
    %268 = arith.addf %7, %9 : vector<2x64xf32>
    %269 = arith.addf %261, %263 : vector<1x64xf32>
    %270 = vector.broadcast %269 : vector<1x64xf32> to vector<2x64xf32>
    %271 = arith.mulf %268, %270 : vector<2x64xf32>
    %272 = arith.subf %265, %267 : vector<2x64xf32>
    %273 = arith.subf %271, %265 : vector<2x64xf32>
    %274 = arith.subf %273, %267 : vector<2x64xf32>
    %275 = arith.addf %257, %272 : vector<2x64xf32>
    %276 = arith.addf %259, %274 : vector<2x64xf32>
    %c11 = arith.constant 11 : index
    %c0_125 = arith.constant 0 : index
    %c0_126 = arith.constant 0 : index
    %277 = vector.load %arg4[%c11, %c0_125, %c0_126] : memref<16x1x64xf32, #tpu.memory_space<vmem>>, vector<1x1x64xf32>
    %278 = vector.shape_cast %277 : vector<1x1x64xf32> to vector<1x64xf32>
    %c11_127 = arith.constant 11 : index
    %c0_128 = arith.constant 0 : index
    %c0_129 = arith.constant 0 : index
    %279 = vector.load %arg5[%c11_127, %c0_128, %c0_129] : memref<16x1x64xf32, #tpu.memory_space<vmem>>, vector<1x1x64xf32>
    %280 = vector.shape_cast %279 : vector<1x1x64xf32> to vector<1x64xf32>
    %281 = vector.broadcast %278 : vector<1x64xf32> to vector<2x64xf32>
    %282 = arith.mulf %12, %281 : vector<2x64xf32>
    %283 = vector.broadcast %280 : vector<1x64xf32> to vector<2x64xf32>
    %284 = arith.mulf %14, %283 : vector<2x64xf32>
    %285 = arith.addf %12, %14 : vector<2x64xf32>
    %286 = arith.addf %278, %280 : vector<1x64xf32>
    %287 = vector.broadcast %286 : vector<1x64xf32> to vector<2x64xf32>
    %288 = arith.mulf %285, %287 : vector<2x64xf32>
    %289 = arith.subf %282, %284 : vector<2x64xf32>
    %290 = arith.subf %288, %282 : vector<2x64xf32>
    %291 = arith.subf %290, %284 : vector<2x64xf32>
    %292 = arith.addf %275, %289 : vector<2x64xf32>
    %293 = arith.addf %276, %291 : vector<2x64xf32>
    %c15 = arith.constant 15 : index
    %c0_130 = arith.constant 0 : index
    %c0_131 = arith.constant 0 : index
    %294 = vector.load %arg4[%c15, %c0_130, %c0_131] : memref<16x1x64xf32, #tpu.memory_space<vmem>>, vector<1x1x64xf32>
    %295 = vector.shape_cast %294 : vector<1x1x64xf32> to vector<1x64xf32>
    %c15_132 = arith.constant 15 : index
    %c0_133 = arith.constant 0 : index
    %c0_134 = arith.constant 0 : index
    %296 = vector.load %arg5[%c15_132, %c0_133, %c0_134] : memref<16x1x64xf32, #tpu.memory_space<vmem>>, vector<1x1x64xf32>
    %297 = vector.shape_cast %296 : vector<1x1x64xf32> to vector<1x64xf32>
    %298 = vector.broadcast %295 : vector<1x64xf32> to vector<2x64xf32>
    %299 = arith.mulf %17, %298 : vector<2x64xf32>
    %300 = vector.broadcast %297 : vector<1x64xf32> to vector<2x64xf32>
    %301 = arith.mulf %19, %300 : vector<2x64xf32>
    %302 = arith.addf %17, %19 : vector<2x64xf32>
    %303 = arith.addf %295, %297 : vector<1x64xf32>
    %304 = vector.broadcast %303 : vector<1x64xf32> to vector<2x64xf32>
    %305 = arith.mulf %302, %304 : vector<2x64xf32>
    %306 = arith.subf %299, %301 : vector<2x64xf32>
    %307 = arith.subf %305, %299 : vector<2x64xf32>
    %308 = arith.subf %307, %301 : vector<2x64xf32>
    %309 = arith.addf %292, %306 : vector<2x64xf32>
    %310 = arith.addf %293, %308 : vector<2x64xf32>
    %c0_135 = arith.constant 0 : index
    %c0_136 = arith.constant 0 : index
    %311 = vector.load %arg6[%c0_135, %c0_136] : memref<64x256xf32, #tpu.memory_space<vmem>>, vector<64x256xf32>
    %cst_137 = arith.constant dense<0.000000e+00> : vector<2x256xf32>
    %312 = tpu.matmul %309, %311, %cst_137 {dimension_numbers = #tpu.dot_dimension_numbers<[1], [0], [0], [1], [0, 0, 1, 1], [], []>} : vector<2x64xf32>, vector<64x256xf32>, vector<2x256xf32> -> vector<2x256xf32>
    %c0_138 = arith.constant 0 : index
    %c0_139 = arith.constant 0 : index
    %313 = vector.load %arg7[%c0_138, %c0_139] : memref<64x256xf32, #tpu.memory_space<vmem>>, vector<64x256xf32>
    %cst_140 = arith.constant dense<0.000000e+00> : vector<2x256xf32>
    %314 = tpu.matmul %310, %313, %cst_140 {dimension_numbers = #tpu.dot_dimension_numbers<[1], [0], [0], [1], [0, 0, 1, 1], [], []>} : vector<2x64xf32>, vector<64x256xf32>, vector<2x256xf32> -> vector<2x256xf32>
    %315 = arith.subf %312, %314 : vector<2x256xf32>
    %c3_141 = arith.constant 3 : index
    %316 = memref.load %arg8[%c3_141] : memref<4xf32, #tpu.memory_space<smem>>
    %317 = vector.broadcast %316 : f32 to vector<2x256xf32>
    %318 = arith.addf %315, %317 : vector<2x256xf32>
    %c0_142 = arith.constant 0 : index
    %c768_143 = arith.constant 768 : index
    %319 = vector.load %arg9[%c0_142, %c768_143] : memref<2x1024xf32, #tpu.memory_space<vmem>>, vector<2x256xf32>
    tpu.vector_store %arg9[%c0_142, %c768_143], %318 {strides = array<i32>} : memref<2x1024xf32, #tpu.memory_space<vmem>>, vector<2x256xf32>,
    return
  }
  func.func @transform_0(%arg0: i32) -> (i32, i32) {
    %c0_i32 = arith.constant 0 : i32
    %c0_i32_0 = arith.constant 0 : i32
    %c0_i32_1 = arith.constant 0 : i32
    return %c0_i32, %c0_i32_0 : i32, i32
  }
  func.func @transform_1(%arg0: i32) -> (i32, i32) {
    %c0_i32 = arith.constant 0 : i32
    %c0_i32_0 = arith.constant 0 : i32
    %c0_i32_1 = arith.constant 0 : i32
    return %c0_i32, %c0_i32_0 : i32, i32
  }
  func.func @transform_2(%arg0: i32) -> (i32, i32) {
    %c0_i32 = arith.constant 0 : i32
    %c0_i32_0 = arith.constant 0 : i32
    %c0_i32_1 = arith.constant 0 : i32
    return %c0_i32, %c0_i32_0 : i32, i32
  }
  func.func @transform_3(%arg0: i32) -> (i32, i32, i32) {
    %c0_i32 = arith.constant 0 : i32
    %c0_i32_0 = arith.constant 0 : i32
    %c0_i32_1 = arith.constant 0 : i32
    %c0_i32_2 = arith.constant 0 : i32
    return %c0_i32, %c0_i32_0, %c0_i32_1 : i32, i32, i32
  }
  func.func @transform_4(%arg0: i32) -> (i32, i32, i32) {
    %c0_i32 = arith.constant 0 : i32
    %c0_i32_0 = arith.constant 0 : i32
    %c0_i32_1 = arith.constant 0 : i32
    %c0_i32_2 = arith.constant 0 : i32
    return %c0_i32, %c0_i32_0, %c0_i32_1 : i32, i32, i32
  }
  func.func @transform_5(%arg0: i32) -> (i32, i32) {
    %c0_i32 = arith.constant 0 : i32
    %c0_i32_0 = arith.constant 0 : i32
    %c0_i32_1 = arith.constant 0 : i32
    return %c0_i32, %c0_i32_0 : i32, i32
  }
  func.func @transform_6(%arg0: i32) -> (i32, i32) {
    %c0_i32 = arith.constant 0 : i32
    %c0_i32_0 = arith.constant 0 : i32
    %c0_i32_1 = arith.constant 0 : i32
    return %c0_i32, %c0_i32_0 : i32, i32
  }
  func.func @transform_7(%arg0: i32) -> i32 {
    %c0_i32 = arith.constant 0 : i32
    %c0_i32_0 = arith.constant 0 : i32
    return %c0_i32 : i32
  }
  func.func @transform_8(%arg0: i32) -> (i32, i32) {
    %c0_i32 = arith.constant 0 : i32
    %c0_i32_0 = arith.constant 0 : i32
    %c0_i32_1 = arith.constant 0 : i32
    return %c0_i32, %c0_i32_0 : i32, i32
  }
}

</mosaic_0001>

<bundles_post_ra>
// kernel: subconv_forward.1
= control target key start
LH: loop header
LB: loop body
LE: loop exit
PB: predicated region body
PF: predicated region fallthrough
CT: control target
= control target key end

     0   :  { %13 = vsyncpa [#allocation3], 0  ;;  %s3535_s0 = inlined_call_operand.vmem [shape: f32[2,1024], index: 0, kind: input, shape index: {}]   ;;  %s3536_s1 = inlined_call_operand.vmem [shape: f32[256,64], index: 1, kind: input, shape index: {}]   ;;  %s3537_s2 = inlined_call_operand.vmem [shape: f32[256,64], index: 2, kind: input, shape index: {}]   ;;  %s3538_s3 = inlined_call_operand.vmem [shape: f32[16,1,64], index: 3, kind: input, shape index: {}]   ;;  %s3539_s4 = inlined_call_operand.vmem [shape: f32[16,1,64], index: 4, kind: input, shape index: {}]   ;;  %s3540_s5 = inlined_call_operand.vmem [shape: f32[64,256], index: 5, kind: input, shape index: {}]   ;;  %s3541_s6 = inlined_call_operand.vmem [shape: f32[64,256], index: 6, kind: input, shape index: {}]   ;;  %s3542_s7 = inlined_call_operand.vmem [shape: f32[4], index: 7, kind: input, shape index: {}]   ;;  %s3543_s8 = inlined_call_operand.vmem [shape: f32[2,1024], index: 8, kind: output, shape index: {}]  }
   0x1   :  { %s34_s29 = sshll.u32 %s3542_s7, 4  ;;  %s35_s29 = int_to_ptr.vmem [resolvable:$true] %s34_s29 }
   0x2   :  { %s2333_s30 = scalar_lea.vmem %s35_s29, 16  ;;  %p2338_p1 = scmp.lt.s32.totalorder %s35_s29, %s35_s29 }
   0x3   :  { %p2334_p0 = scmp.ne.s32.totalorder %s35_s29, %s2333_s30  ;;  %p2339_p2 = scmp.lt.s32.totalorder %s2333_s30, %s2333_s30 }
   0x5   :  { %p2340_p3 = por %p2339_p2, %p2338_p1 }
   0x7   :  { %p2341_p4 = pnand %p2340_p3, %p2334_p0 }
   0x9   :  { %2344 = shalt.err (!%p2341_p4)
}
   0xa   :  { %s2347_s9 = smov [#allocation2]  }
   0xb   :  { %37 = dma.vmem_to_smem %s35_s29, 16, %s2347_s9, [#allocation3]  }
   0xc   :  { %2345 = dma.done.wait [#allocation3], 16  }
   0xd   :  { %2346 = vsyncadd [#allocation3], 4294967280 }
   0xe   :  { %41 = sfence }
   0xf   :  { %v2400_v0 = vld [vmem:[%s3536_s1 + $0xf8] sm:$0xff]  ;;  %v2422_v4 = vld [vmem:[%s3536_s1 + $0xf0] sm:$0xff]  ;;  %v2444_v8 = vld [vmem:[%s3536_s1 + $0xe8] sm:$0xff]  ;;  %vm854_vm0 = vcmask 523264   ;;  %s2025_s23 = sld [smem:[#allocation2 + $0x1]] }
  0x10   :  { %v2405_v1 = vld [vmem:[%s3537_s2 + $0xf8] sm:$0xff]  ;;  %2051 = vmatprep.subr.mxu0 %v2400_v0  ;;  %v2427_v5 = vld [vmem:[%s3537_s2 + $0xf0] sm:$0xff]  ;;  %v2451_v9 = vld [vmem:[%s3537_s2 + $0xe8] sm:$0xff]  ;;  %s2037_s24 = sld [smem:[#allocation2 + $0x2]] }
  0x11   :  { %v2410_v2 = vld [vmem:[%s3536_s1 + $0x78] sm:$0xff]  ;;  %2086 = vmatprep.subr.mxu1 %v2405_v1  ;;  %v2434_v6 = vld [vmem:[%s3536_s1 + $0x70] sm:$0xff]  ;;  %v2456_v10 = vld [vmem:[%s3536_s1 + $0x68] sm:$0xff]  ;;  %s2049_s27 = sld [smem:[#allocation2 + $0x3]] }
  0x12   :  { %v2417_v3 = vld [vmem:[%s3537_s2 + $0x78] sm:$0xff]  ;;  %2052 = vmatpush3.msra.mxu0 %v2410_v2  ;;  %v2439_v7 = vld [vmem:[%s3537_s2 + $0x70] sm:$0xff]  ;;  %v2461_v11 = vld [vmem:[%s3537_s2 + $0x68] sm:$0xff] }
  0x13   :  { %2087 = vmatpush3.msra.mxu1 %v2417_v3  ;;  %2053 = vmatprep.subr.mxu0 %v2422_v4  ;;  %v2468_v12 = vld [vmem:[%s3536_s1 + $0xe0] sm:$0xff]  ;;  %v2492_v16 = vld [vmem:[%s3536_s1 + $0xd8] sm:$0xff]  ;;  %v2516_v20 = vld [vmem:[%s3536_s1 + $0xd0] sm:$0xff] }
  0x14   :  { %2088 = vmatprep.subr.mxu1 %v2427_v5  ;;  %2054 = vmatpush3.msra.mxu0 %v2434_v6  ;;  %v2473_v13 = vld [vmem:[%s3537_s2 + $0xe0] sm:$0xff]  ;;  %v2497_v17 = vld [vmem:[%s3537_s2 + $0xd8] sm:$0xff]  ;;  %v2521_v21 = vld [vmem:[%s3537_s2 + $0xd0] sm:$0xff] }
  0x15   :  { %2089 = vmatpush3.msra.mxu1 %v2439_v7  ;;  %2055 = vmatprep.subr.mxu0 %v2444_v8  ;;  %v2480_v14 = vld [vmem:[%s3536_s1 + $0x60] sm:$0xff]  ;;  %v2504_v18 = vld [vmem:[%s3536_s1 + $0x58] sm:$0xff]  ;;  %v2528_v22 = vld [vmem:[%s3536_s1 + $0x50] sm:$0xff] }
  0x16   :  { %2090 = vmatprep.subr.mxu1 %v2451_v9  ;;  %v2485_v15 = vld [vmem:[%s3537_s2 + $0x60] sm:$0xff]  ;;  %2056 = vmatpush3.msra.mxu0 %v2456_v10  ;;  %v2509_v19 = vld [vmem:[%s3537_s2 + $0x58] sm:$0xff]  ;;  %v2533_v23 = vld [vmem:[%s3537_s2 + $0x50] sm:$0xff] }
  0x17   :  { %2091 = vmatpush3.msra.mxu1 %v2461_v11  ;;  %2057 = vmatprep.subr.mxu0 %v2468_v12  ;;  %v2540_v24 = vld [vmem:[%s3536_s1 + $0xc8] sm:$0xff]  ;;  %v2564_v28 = vld [vmem:[%s3536_s1 + $0xc0] sm:$0xff]  ;;  %v2588_v32 = vld [vmem:[%s3536_s1 + $0xb8] sm:$0xff] }
  0x18   :  { %2092 = vmatprep.subr.mxu1 %v2473_v13  ;;  %2058 = vmatpush3.msra.mxu0 %v2480_v14  ;;  %v2545_v25 = vld [vmem:[%s3537_s2 + $0xc8] sm:$0xff]  ;;  %v2569_v29 = vld [vmem:[%s3537_s2 + $0xc0] sm:$0xff]  ;;  %v2593_v33 = vld [vmem:[%s3537_s2 + $0xb8] sm:$0xff] }
  0x19   :  { %2093 = vmatpush3.msra.mxu1 %v2485_v15  ;;  %2059 = vmatprep.subr.mxu0 %v2492_v16  ;;  %v2552_v26 = vld [vmem:[%s3536_s1 + $0x48] sm:$0xff]  ;;  %v2576_v30 = vld [vmem:[%s3536_s1 + $0x40] sm:$0xff]  ;;  %v2600_v34 = vld [vmem:[%s3536_s1 + $0x38] sm:$0xff] }
  0x1a   :  { %2094 = vmatprep.subr.mxu1 %v2497_v17  ;;  %2060 = vmatpush3.msra.mxu0 %v2504_v18  ;;  %v2557_v27 = vld [vmem:[%s3537_s2 + $0x48] sm:$0xff]  ;;  %v2581_v31 = vld [vmem:[%s3537_s2 + $0x40] sm:$0xff]  ;;  %v2605_v35 = vld [vmem:[%s3537_s2 + $0x38] sm:$0xff] }
  0x1b   :  { %2095 = vmatpush3.msra.mxu1 %v2509_v19  ;;  %2061 = vmatprep.subr.mxu0 %v2516_v20  ;;  %v2612_v36 = vld [vmem:[%s3536_s1 + $0xb0] sm:$0xff]  ;;  %v2636_v40 = vld [vmem:[%s3536_s1 + $0xa8] sm:$0xff]  ;;  %v2660_v44 = vld [vmem:[%s3536_s1 + $0xa0] sm:$0xff] }
  0x1c   :  { %2096 = vmatprep.subr.mxu1 %v2521_v21  ;;  %2062 = vmatpush3.msra.mxu0 %v2528_v22  ;;  %v2617_v37 = vld [vmem:[%s3537_s2 + $0xb0] sm:$0xff]  ;;  %v2641_v41 = vld [vmem:[%s3537_s2 + $0xa8] sm:$0xff]  ;;  %v2665_v45 = vld [vmem:[%s3537_s2 + $0xa0] sm:$0xff] }
  0x1d   :  { %2097 = vmatpush3.msra.mxu1 %v2533_v23  ;;  %2063 = vmatprep.subr.mxu0 %v2540_v24  ;;  %v2624_v38 = vld [vmem:[%s3536_s1 + $0x30] sm:$0xff]  ;;  %3585 = vst [vmem:[#allocation5_spill] sm:$0xff] %v2641_v41  ;;  %v2648_v42 = vld [vmem:[%s3536_s1 + $0x28] sm:$0xff]  ;;  %v2672_v46 = vld [vmem:[%s3536_s1 + $0x20] sm:$0xff] }
  0x1e   :  { %2098 = vmatprep.subr.mxu1 %v2545_v25  ;;  %2064 = vmatpush3.msra.mxu0 %v2552_v26  ;;  %v2629_v39 = vld [vmem:[%s3537_s2 + $0x30] sm:$0xff]  ;;  %v2653_v43 = vld [vmem:[%s3537_s2 + $0x28] sm:$0xff]  ;;  %3586 = vst [vmem:[#allocation6_spill] sm:$0xff] %v2672_v46  ;;  %v2677_v47 = vld [vmem:[%s3537_s2 + $0x20] sm:$0xff] }
  0x1f   :  { %2099 = vmatpush3.msra.mxu1 %v2557_v27  ;;  %2065 = vmatprep.subr.mxu0 %v2564_v28  ;;  %3587 = vst [vmem:[#allocation7_spill] sm:$0xff] %v2677_v47  ;;  %v2684_v48 = vld [vmem:[%s3536_s1 + $0x98] sm:$0xff]  ;;  %v2708_v52 = vld [vmem:[%s3536_s1 + $0x90] sm:$0xff]  ;;  %v2735_v57 = vld [vmem:[%s3536_s1 + $0x88] sm:$0xff] }
  0x20   :  { %2100 = vmatprep.subr.mxu1 %v2569_v29  ;;  %2066 = vmatpush3.msra.mxu0 %v2576_v30  ;;  %v2689_v49 = vld [vmem:[%s3537_s2 + $0x98] sm:$0xff]  ;;  %v2713_v53 = vld [vmem:[%s3537_s2 + $0x90] sm:$0xff]  ;;  %v2002_v56 = vld.sshfl [vmem:[%s3535_s0] sm:$0x33 pattern:$0x76325410] }
  0x21   :  { %2101 = vmatpush3.msra.mxu1 %v2581_v31  ;;  %2067 = vmatprep.subr.mxu0 %v2588_v32  ;;  %v2696_v50 = vld [vmem:[%s3536_s1 + $0x18] sm:$0xff]  ;;  %v2720_v54 = vld [vmem:[%s3536_s1 + $0x10] sm:$0xff]  ;;  %v2740_v58 = vld [vmem:[%s3537_s2 + $0x88] sm:$0xff]  ;;  %v83_v63 = vcombine.high %v2002_v56, %v2002_v56 }
  0x22   :  { %2102 = vmatprep.subr.mxu1 %v2593_v33  ;;  %2068 = vmatpush3.msra.mxu0 %v2600_v34  ;;  %v2701_v51 = vld [vmem:[%s3537_s2 + $0x18] sm:$0xff]  ;;  %3588 = vst [vmem:[#allocation8_spill] sm:$0xff] %v2720_v54  ;;  %v2725_v55 = vld [vmem:[%s3537_s2 + $0x10] sm:$0xff]  ;;  %v2747_v59 = vld [vmem:[%s3536_s1 + $0x8] sm:$0xff] }
  0x23   :  { %2103 = vmatpush3.msra.mxu1 %v2605_v35  ;;  %2069 = vmatprep.subr.mxu0 %v2612_v36  ;;  %3589 = vst [vmem:[#allocation9_spill] sm:$0xff] %v2725_v55  ;;  %v2752_v60 = vld [vmem:[%s3537_s2 + $0x8] sm:$0xff]  ;;  %v2759_v61 = vld [vmem:[%s3536_s1 + $0x80] sm:$0xff] }
  0x24   :  { %2104 = vmatprep.subr.mxu1 %v2617_v37  ;;  %2070 = vmatpush3.msra.mxu0 %v2624_v38  ;;  %v2764_v62 = vld [vmem:[%s3537_s2 + $0x80] sm:$0xff] }
  0x25   :  { %2105 = vmatpush3.msra.mxu1 %v2629_v39  ;;  %2071 = vmatprep.subr.mxu0 %v2636_v40 }
  0x26   :  { %2106 = vmatprep.subr.mxu1 %v2641_v41  ;;  %2072 = vmatpush3.msra.mxu0 %v2648_v42 }
  0x27   :  { %2107 = vmatpush3.msra.mxu1 %v2653_v43  ;;  %2073 = vmatprep.subr.mxu0 %v2660_v44 }
  0x28   :  { %2108 = vmatprep.subr.mxu1 %v2665_v45  ;;  %2074 = vmatpush3.msra.mxu0 %v2672_v46 }
  0x29   :  { %2109 = vmatpush3.msra.mxu1 %v2677_v47  ;;  %2075 = vmatprep.subr.mxu0 %v2684_v48 }
  0x2a   :  { %2110 = vmatprep.subr.mxu1 %v2689_v49  ;;  %2076 = vmatpush3.msra.mxu0 %v2696_v50 }
  0x2b   :  { %2111 = vmatpush3.msra.mxu1 %v2701_v51  ;;  %2077 = vmatprep.subr.mxu0 %v2708_v52 }
  0x2c   :  { %2112 = vmatprep.subr.mxu1 %v2713_v53  ;;  %2078 = vmatpush3.msra.mxu0 %v2720_v54  ;;  %v2771_v54 = vld [vmem:[%s3536_s1] sm:$0xff] }
  0x2d   :  { %2113 = vmatpush3.msra.mxu1 %v2725_v55  ;;  %2079 = vmatprep.subr.mxu0 %v2735_v57  ;;  %v2778_v55 = vld [vmem:[%s3537_s2] sm:$0xff] }
  0x2e   :  { %2114 = vmatprep.subr.mxu1 %v2740_v58  ;;  %2080 = vmatpush3.msra.mxu0 %v2747_v59 }
  0x2f   :  { %2115 = vmatpush3.msra.mxu1 %v2752_v60  ;;  %2081 = vmatprep.subr.mxu0 %v2759_v61 }
  0x30   :  { %2116 = vmatprep.subr.mxu1 %v2764_v62  ;;  %2082 = vmatpush3.msra.mxu0 %v2771_v54 }
  0x31   :  { %150 = vmatprep.mubr.f32.mxu0 %v83_v63  ;;  %2117 = vmatpush3.msra.mxu1 %v2778_v55 }
  0x32   :  { %252 = vmatprep.mubr.f32.mxu1 %v83_v63  ;;  %151 = vmatmul.mubr.f32.vlgmr.msra.gmra.mxu0 %v2002_v56  ;;  %v3590_v63 = vld [vmem:[#allocation8_spill] sm:$0xff] }
  0x33   :  { %253 = vmatmul.mubr.f32.vlgmr.msra.gmra.mxu1 %v2002_v56  ;;  %2121 = vmatprep.subr.mxu0 %v2400_v0  ;;  %v2003_v56 = vld.sshfl [vmem:[%s3535_s0 + $0x4] sm:$0x33 pattern:$0x76325410] }
  0x34   :  { %2156 = vmatprep.subr.mxu1 %v2405_v1  ;;  %2122 = vmatpush3.msra.mxu0 %v2410_v2 }
  0x35   :  { %2157 = vmatpush3.msra.mxu1 %v2417_v3  ;;  %2123 = vmatprep.subr.mxu0 %v2422_v4 }
  0x36   :  { %2158 = vmatprep.subr.mxu1 %v2427_v5  ;;  %2124 = vmatpush3.msra.mxu0 %v2434_v6 }
  0x37   :  { %2159 = vmatpush3.msra.mxu1 %v2439_v7  ;;  %2125 = vmatprep.subr.mxu0 %v2444_v8 }
  0x38   :  { %2160 = vmatprep.subr.mxu1 %v2451_v9  ;;  %2126 = vmatpush3.msra.mxu0 %v2456_v10 }
  0x39   :  { %2161 = vmatpush3.msra.mxu1 %v2461_v11  ;;  %2127 = vmatprep.subr.mxu0 %v2468_v12 }
  0x3a   :  { %2162 = vmatprep.subr.mxu1 %v2473_v13  ;;  %2128 = vmatpush3.msra.mxu0 %v2480_v14 }
  0x3b   :  { %2163 = vmatpush3.msra.mxu1 %v2485_v15  ;;  %2129 = vmatprep.subr.mxu0 %v2492_v16 }
  0x3c   :  { %2164 = vmatprep.subr.mxu1 %v2497_v17  ;;  %2130 = vmatpush3.msra.mxu0 %v2504_v18 }
  0x3d   :  { %2165 = vmatpush3.msra.mxu1 %v2509_v19  ;;  %2131 = vmatprep.subr.mxu0 %v2516_v20 }
  0x3e   :  { %2166 = vmatprep.subr.mxu1 %v2521_v21  ;;  %2132 = vmatpush3.msra.mxu0 %v2528_v22 }
  0x3f   :  { %2167 = vmatpush3.msra.mxu1 %v2533_v23  ;;  %2133 = vmatprep.subr.mxu0 %v2540_v24 }
  0x40   :  { %2168 = vmatprep.subr.mxu1 %v2545_v25  ;;  %2134 = vmatpush3.msra.mxu0 %v2552_v26 }
  0x41   :  { %2169 = vmatpush3.msra.mxu1 %v2557_v27  ;;  %2135 = vmatprep.subr.mxu0 %v2564_v28 }
  0x42   :  { %2170 = vmatprep.subr.mxu1 %v2569_v29  ;;  %2136 = vmatpush3.msra.mxu0 %v2576_v30 }
  0x43   :  { %2171 = vmatpush3.msra.mxu1 %v2581_v31  ;;  %2137 = vmatprep.subr.mxu0 %v2588_v32 }
  0x44   :  { %2172 = vmatprep.subr.mxu1 %v2593_v33  ;;  %2138 = vmatpush3.msra.mxu0 %v2600_v34 }
  0x45   :  { %2173 = vmatpush3.msra.mxu1 %v2605_v35  ;;  %2139 = vmatprep.subr.mxu0 %v2612_v36 }
  0x46   :  { %2174 = vmatprep.subr.mxu1 %v2617_v37  ;;  %2140 = vmatpush3.msra.mxu0 %v2624_v38 }
  0x47   :  { %2175 = vmatpush3.msra.mxu1 %v2629_v39  ;;  %2141 = vmatprep.subr.mxu0 %v2636_v40 }
  0x48   :  { %2176 = vmatprep.subr.mxu1 %v2641_v41  ;;  %2142 = vmatpush3.msra.mxu0 %v2648_v42 }
  0x49   :  { %2177 = vmatpush3.msra.mxu1 %v2653_v43  ;;  %2143 = vmatprep.subr.mxu0 %v2660_v44 }
  0x4a   :  { %2178 = vmatprep.subr.mxu1 %v2665_v45  ;;  %2144 = vmatpush3.msra.mxu0 %v2672_v46  ;;  %v3591_v46 = vld [vmem:[#allocation9_spill] sm:$0xff] }
  0x4b   :  { %2179 = vmatpush3.msra.mxu1 %v2677_v47  ;;  %2145 = vmatprep.subr.mxu0 %v2684_v48  ;;  %v267_v47 = vcombine.high %v2003_v56, %v2003_v56 }
  0x4c   :  { %2180 = vmatprep.subr.mxu1 %v2689_v49  ;;  %2146 = vmatpush3.msra.mxu0 %v2696_v50 }
  0x4d   :  { %2181 = vmatpush3.msra.mxu1 %v2701_v51  ;;  %2147 = vmatprep.subr.mxu0 %v2708_v52 }
  0x4e   :  { %2182 = vmatprep.subr.mxu1 %v2713_v53  ;;  %2148 = vmatpush3.msra.mxu0 %v3590_v63 }
  0x4f   :  { %2183 = vmatpush3.msra.mxu1 %v3591_v46  ;;  %2149 = vmatprep.subr.mxu0 %v2735_v57 }
  0x50   :  { %2184 = vmatprep.subr.mxu1 %v2740_v58  ;;  %2150 = vmatpush3.msra.mxu0 %v2747_v59 }
  0x51   :  { %2185 = vmatpush3.msra.mxu1 %v2752_v60  ;;  %2151 = vmatprep.subr.mxu0 %v2759_v61 }
  0x52   :  { %2186 = vmatprep.subr.mxu1 %v2764_v62  ;;  %2152 = vmatpush3.msra.mxu0 %v2771_v54 }
  0x53   :  { %334 = vmatprep.mubr.f32.mxu0 %v267_v47  ;;  %2187 = vmatpush3.msra.mxu1 %v2778_v55 }
  0x54   :  { %404 = vmatprep.mubr.f32.mxu1 %v267_v47  ;;  %335 = vmatmul.mubr.f32.vlgmr.msra.gmra.mxu0 %v2003_v56  ;;  %v3592_v47 = vld [vmem:[#allocation6_spill] sm:$0xff] }
  0x55   :  { %405 = vmatmul.mubr.f32.vlgmr.msra.gmra.mxu1 %v2003_v56  ;;  %2191 = vmatprep.subr.mxu0 %v2400_v0  ;;  %v3593_v56 = vld [vmem:[#allocation7_spill] sm:$0xff] }
  0x56   :  { %2226 = vmatprep.subr.mxu1 %v2405_v1  ;;  %2192 = vmatpush3.msra.mxu0 %v2410_v2 }
  0x57   :  { %2227 = vmatpush3.msra.mxu1 %v2417_v3  ;;  %2193 = vmatprep.subr.mxu0 %v2422_v4 }
  0x58   :  { %2228 = vmatprep.subr.mxu1 %v2427_v5  ;;  %2194 = vmatpush3.msra.mxu0 %v2434_v6 }
  0x59   :  { %2229 = vmatpush3.msra.mxu1 %v2439_v7  ;;  %2195 = vmatprep.subr.mxu0 %v2444_v8 }
  0x5a   :  { %2230 = vmatprep.subr.mxu1 %v2451_v9  ;;  %2196 = vmatpush3.msra.mxu0 %v2456_v10 }
  0x5b   :  { %2231 = vmatpush3.msra.mxu1 %v2461_v11  ;;  %2197 = vmatprep.subr.mxu0 %v2468_v12 }
  0x5c   :  { %2232 = vmatprep.subr.mxu1 %v2473_v13  ;;  %2198 = vmatpush3.msra.mxu0 %v2480_v14 }
  0x5d   :  { %2233 = vmatpush3.msra.mxu1 %v2485_v15  ;;  %2199 = vmatprep.subr.mxu0 %v2492_v16 }
  0x5e   :  { %2234 = vmatprep.subr.mxu1 %v2497_v17  ;;  %2200 = vmatpush3.msra.mxu0 %v2504_v18 }
  0x5f   :  { %2235 = vmatpush3.msra.mxu1 %v2509_v19  ;;  %2201 = vmatprep.subr.mxu0 %v2516_v20 }
  0x60   :  { %2236 = vmatprep.subr.mxu1 %v2521_v21  ;;  %2202 = vmatpush3.msra.mxu0 %v2528_v22 }
  0x61   :  { %2237 = vmatpush3.msra.mxu1 %v2533_v23  ;;  %2203 = vmatprep.subr.mxu0 %v2540_v24 }
  0x62   :  { %2238 = vmatprep.subr.mxu1 %v2545_v25  ;;  %2204 = vmatpush3.msra.mxu0 %v2552_v26 }
  0x63   :  { %2239 = vmatpush3.msra.mxu1 %v2557_v27  ;;  %2205 = vmatprep.subr.mxu0 %v2564_v28 }
  0x64   :  { %2240 = vmatprep.subr.mxu1 %v2569_v29  ;;  %2206 = vmatpush3.msra.mxu0 %v2576_v30 }
  0x65   :  { %2241 = vmatpush3.msra.mxu1 %v2581_v31  ;;  %2207 = vmatprep.subr.mxu0 %v2588_v32 }
  0x66   :  { %2242 = vmatprep.subr.mxu1 %v2593_v33  ;;  %2208 = vmatpush3.msra.mxu0 %v2600_v34 }
  0x67   :  { %2243 = vmatpush3.msra.mxu1 %v2605_v35  ;;  %2209 = vmatprep.subr.mxu0 %v2612_v36 }
  0x68   :  { %2244 = vmatprep.subr.mxu1 %v2617_v37  ;;  %2210 = vmatpush3.msra.mxu0 %v2624_v38 }
  0x69   :  { %2245 = vmatpush3.msra.mxu1 %v2629_v39  ;;  %2211 = vmatprep.subr.mxu0 %v2636_v40 }
  0x6a   :  { %2246 = vmatprep.subr.mxu1 %v2641_v41  ;;  %2212 = vmatpush3.msra.mxu0 %v2648_v42  ;;  %v2004_v41 = vld.sshfl [vmem:[%s3535_s0 + $0x8] sm:$0x33 pattern:$0x76325410] }
  0x6b   :  { %2247 = vmatpush3.msra.mxu1 %v2653_v43  ;;  %2213 = vmatprep.subr.mxu0 %v2660_v44 }
  0x6c   :  { %2248 = vmatprep.subr.mxu1 %v2665_v45  ;;  %2214 = vmatpush3.msra.mxu0 %v3592_v47 }
  0x6d   :  { %2249 = vmatpush3.msra.mxu1 %v3593_v56  ;;  %2215 = vmatprep.subr.mxu0 %v2684_v48  ;;  %v419_v56 = vcombine.high %v2004_v41, %v2004_v41 }
  0x6e   :  { %2250 = vmatprep.subr.mxu1 %v2689_v49  ;;  %2216 = vmatpush3.msra.mxu0 %v2696_v50 }
  0x6f   :  { %2251 = vmatpush3.msra.mxu1 %v2701_v51  ;;  %2217 = vmatprep.subr.mxu0 %v2708_v52 }
  0x70   :  { %2252 = vmatprep.subr.mxu1 %v2713_v53  ;;  %2218 = vmatpush3.msra.mxu0 %v3590_v63 }
  0x71   :  { %2253 = vmatpush3.msra.mxu1 %v3591_v46  ;;  %2219 = vmatprep.subr.mxu0 %v2735_v57 }
  0x72   :  { %2254 = vmatprep.subr.mxu1 %v2740_v58  ;;  %2220 = vmatpush3.msra.mxu0 %v2747_v59 }
  0x73   :  { %2255 = vmatpush3.msra.mxu1 %v2752_v60  ;;  %2221 = vmatprep.subr.mxu0 %v2759_v61 }
  0x74   :  { %2256 = vmatprep.subr.mxu1 %v2764_v62  ;;  %2222 = vmatpush3.msra.mxu0 %v2771_v54 }
  0x75   :  { %486 = vmatprep.mubr.f32.mxu0 %v419_v56  ;;  %2257 = vmatpush3.msra.mxu1 %v2778_v55 }
  0x76   :  { %556 = vmatprep.mubr.f32.mxu1 %v419_v56  ;;  %487 = vmatmul.mubr.f32.vlgmr.msra.gmra.mxu0 %v2004_v41 }
  0x77   :  { %557 = vmatmul.mubr.f32.vlgmr.msra.gmra.mxu1 %v2004_v41  ;;  %2261 = vmatprep.subr.mxu0 %v2400_v0  ;;  %v3594_v0 = vld [vmem:[#allocation5_spill] sm:$0xff] }
  0x78   :  { %2296 = vmatprep.subr.mxu1 %v2405_v1  ;;  %2262 = vmatpush3.msra.mxu0 %v2410_v2  ;;  %v3595_v1 = vld [vmem:[#allocation7_spill] sm:$0xff]  ;;  %v2005_v2 = vld.sshfl [vmem:[%s3535_s0 + $0xc] sm:$0x33 pattern:$0x76325410] }
  0x79   :  { %2297 = vmatpush3.msra.mxu1 %v2417_v3  ;;  %2263 = vmatprep.subr.mxu0 %v2422_v4  ;;  %v571_v3 = vcombine.high %v2005_v2, %v2005_v2  ;;  %v2988_v4 = vld [vmem:[%s3540_s5 + $0x78] sm:$0xff] }
  0x7a   :  { %2298 = vmatprep.subr.mxu1 %v2427_v5  ;;  %2264 = vmatpush3.msra.mxu0 %v2434_v6  ;;  %3596 = vst [vmem:[#allocation8_spill] sm:$0xff] %v2988_v4  ;;  %v2993_v5 = vld [vmem:[%s3540_s5 + $0x70] sm:$0xff]  ;;  %v2998_v6 = vld [vmem:[%s3540_s5 + $0x68] sm:$0xff] }
  0x7b   :  { %2299 = vmatpush3.msra.mxu1 %v2439_v7  ;;  %2265 = vmatprep.subr.mxu0 %v2444_v8  ;;  %v3004_v7 = vld [vmem:[%s3540_s5 + $0x60] sm:$0xff]  ;;  %v3009_v8 = vld [vmem:[%s3541_s6 + $0x78] sm:$0xff] }
  0x7c   :  { %2300 = vmatprep.subr.mxu1 %v2451_v9  ;;  %2266 = vmatpush3.msra.mxu0 %v2456_v10  ;;  %3597 = vst [vmem:[#allocation9_spill] sm:$0xff] %v3009_v8  ;;  %v3015_v9 = vld [vmem:[%s3540_s5 + $0x58] sm:$0xff]  ;;  %v3021_v10 = vld [vmem:[%s3541_s6 + $0x70] sm:$0xff] }
  0x7d   :  { %2301 = vmatpush3.msra.mxu1 %v2461_v11  ;;  %2267 = vmatprep.subr.mxu0 %v2468_v12  ;;  %v3027_v11 = vld [vmem:[%s3540_s5 + $0x50] sm:$0xff]  ;;  %v3036_v12 = vld [vmem:[%s3540_s5 + $0x48] sm:$0xff] }
  0x7e   :  { %2302 = vmatprep.subr.mxu1 %v2473_v13  ;;  %2268 = vmatpush3.msra.mxu0 %v2480_v14  ;;  %v3041_v13 = vld [vmem:[%s3541_s6 + $0x68] sm:$0xff]  ;;  %v3048_v14 = vld [vmem:[%s3540_s5 + $0x40] sm:$0xff] }
  0x7f   :  { %2303 = vmatpush3.msra.mxu1 %v2485_v15  ;;  %2269 = vmatprep.subr.mxu0 %v2492_v16  ;;  %v3053_v15 = vld [vmem:[%s3541_s6 + $0x60] sm:$0xff]  ;;  %v3060_v16 = vld [vmem:[%s3540_s5 + $0x38] sm:$0xff] }
  0x80   :  { %2304 = vmatprep.subr.mxu1 %v2497_v17  ;;  %2270 = vmatpush3.msra.mxu0 %v2504_v18  ;;  %v3066_v17 = vld [vmem:[%s3541_s6 + $0x58] sm:$0xff]  ;;  %v3071_v18 = vld [vmem:[%s3540_s5 + $0x30] sm:$0xff] }
  0x81   :  { %2305 = vmatpush3.msra.mxu1 %v2509_v19  ;;  %2271 = vmatprep.subr.mxu0 %v2516_v20  ;;  %3598 = vst [vmem:[#allocation6_spill] sm:$0xff] %v3066_v17  ;;  %3599 = vst [vmem:[#allocation5_spill] sm:$0xff] %v3071_v18  ;;  %v3076_v19 = vld [vmem:[%s3541_s6 + $0x50] sm:$0xff]  ;;  %v3083_v20 = vld [vmem:[%s3540_s5 + $0x28] sm:$0xff] }
  0x82   :  { %2306 = vmatprep.subr.mxu1 %v2521_v21  ;;  %2272 = vmatpush3.msra.mxu0 %v2528_v22  ;;  %v3088_v21 = vld [vmem:[%s3541_s6 + $0x48] sm:$0xff]  ;;  %v3093_v22 = vld [vmem:[%s3540_s5 + $0x20] sm:$0xff] }
  0x83   :  { %2307 = vmatpush3.msra.mxu1 %v2533_v23  ;;  %2273 = vmatprep.subr.mxu0 %v2540_v24  ;;  %3600 = vst [vmem:[#allocation7_spill] sm:$0xff] %v3093_v22  ;;  %v3100_v23 = vld [vmem:[%s3541_s6 + $0x40] sm:$0xff]  ;;  %v3105_v24 = vld [vmem:[%s3540_s5 + $0x18] sm:$0xff] }
  0x84   :  { %2308 = vmatprep.subr.mxu1 %v2545_v25  ;;  %2274 = vmatpush3.msra.mxu0 %v2552_v26  ;;  %v3110_v25 = vld [vmem:[%s3541_s6 + $0x38] sm:$0xff]  ;;  %v3117_v26 = vld [vmem:[%s3540_s5 + $0x10] sm:$0xff] }
  0x85   :  { %2309 = vmatpush3.msra.mxu1 %v2557_v27  ;;  %2275 = vmatprep.subr.mxu0 %v2564_v28  ;;  %3601 = vst [vmem:[#allocation10_spill] sm:$0xff] %v3110_v25  ;;  %3602 = vst [vmem:[#allocation11_spill] sm:$0xff] %v3117_v26  ;;  %v3122_v27 = vld [vmem:[%s3541_s6 + $0x30] sm:$0xff]  ;;  %v3127_v28 = vld [vmem:[%s3540_s5 + $0x8] sm:$0xff] }
  0x86   :  { %2310 = vmatprep.subr.mxu1 %v2569_v29  ;;  %2276 = vmatpush3.msra.mxu0 %v2576_v30  ;;  %3603 = vst [vmem:[#allocation12_spill] sm:$0xff] %v3122_v27  ;;  %3604 = vst [vmem:[#allocation13_spill] sm:$0xff] %v3127_v28  ;;  %v3134_v29 = vld [vmem:[%s3541_s6 + $0x28] sm:$0xff]  ;;  %v3139_v30 = vld [vmem:[%s3540_s5] sm:$0xff] }
  0x87   :  { %2311 = vmatpush3.msra.mxu1 %v2581_v31  ;;  %2277 = vmatprep.subr.mxu0 %v2588_v32  ;;  %3605 = vst [vmem:[#allocation14_spill] sm:$0xff] %v3134_v29  ;;  %3606 = vst [vmem:[#allocation15_spill] sm:$0xff] %v3139_v30  ;;  %v3146_v31 = vld [vmem:[%s3541_s6 + $0x20] sm:$0xff]  ;;  %v3153_v32 = vld [vmem:[%s3541_s6 + $0x18] sm:$0xff] }
  0x88   :  { %2312 = vmatprep.subr.mxu1 %v2593_v33  ;;  %2278 = vmatpush3.msra.mxu0 %v2600_v34  ;;  %3607 = vst [vmem:[#allocation16_spill] sm:$0xff] %v3146_v31  ;;  %3608 = vst [vmem:[#allocation17_spill] sm:$0xff] %v3153_v32  ;;  %v3160_v33 = vld [vmem:[%s3541_s6 + $0x10] sm:$0xff]  ;;  %v3553_v34 = vmov 0.0  }
  0x89   :  { %2313 = vmatpush3.msra.mxu1 %v2605_v35  ;;  %2279 = vmatprep.subr.mxu0 %v2612_v36  ;;  %3609 = vst [vmem:[#allocation18_spill] sm:$0xff] %v3160_v33  ;;  %v3167_v35 = vld [vmem:[%s3541_s6 + $0x8] sm:$0xff]  ;;  %v3174_v36 = vld [vmem:[%s3541_s6] sm:$0xff] }
  0x8a   :  { %2314 = vmatprep.subr.mxu1 %v2617_v37  ;;  %2280 = vmatpush3.msra.mxu0 %v2624_v38  ;;  %3610 = vst [vmem:[#allocation19_spill] sm:$0xff] %v3167_v35  ;;  %3611 = vst [vmem:[#allocation20_spill] sm:$0xff] %v3174_v36 }
  0x8b   :  { %2315 = vmatpush3.msra.mxu1 %v2629_v39  ;;  %2281 = vmatprep.subr.mxu0 %v2636_v40 }
  0x8c   :  { %2316 = vmatprep.subr.mxu1 %v3594_v0  ;;  %2282 = vmatpush3.msra.mxu0 %v2648_v42 }
  0x8d   :  { %2317 = vmatpush3.msra.mxu1 %v2653_v43  ;;  %2283 = vmatprep.subr.mxu0 %v2660_v44  ;;  %v717_v43 = vlaneseq }
  0x8e   :  { %2318 = vmatprep.subr.mxu1 %v2665_v45  ;;  %2284 = vmatpush3.msra.mxu0 %v3592_v47 }
  0x8f   :  { %2319 = vmatpush3.msra.mxu1 %v3595_v1  ;;  %2285 = vmatprep.subr.mxu0 %v2684_v48 }
  0x90   :  { %2320 = vmatprep.subr.mxu1 %v2689_v49  ;;  %2286 = vmatpush3.msra.mxu0 %v2696_v50  ;;  %v718_v49 = vshrl.u32 %v717_v43, 7  ;;  %v2006_v50 = vld [vmem:[%s3538_s3 + $0x4] sm:$0x1] }
  0x91   :  { %2321 = vmatpush3.msra.mxu1 %v2701_v51  ;;  %2287 = vmatprep.subr.mxu0 %v2708_v52  ;;  %v2007_v51 = vld [vmem:[%s3539_s4 + $0x4] sm:$0x1]  ;;  %v714_v52 = vld [vmem:[%s3538_s3] sm:$0x1] }
  0x92   :  { %2322 = vmatprep.subr.mxu1 %v2713_v53  ;;  %2288 = vmatpush3.msra.mxu0 %v3590_v63  ;;  %v715_v53 = vld [vmem:[%s3539_s4] sm:$0x1]  ;;  %v3205_v63 = vsub.s32 0, %v718_v49  ;;  %v2010_v49 = vld [vmem:[%s3538_s3 + $0xc] sm:$0x1] }
  0x93   :  { %2323 = vmatpush3.msra.mxu1 %v3591_v46  ;;  %2289 = vmatprep.subr.mxu0 %v2735_v57  ;;  %v731_v56 = vadd.f32 %v715_v53, %v714_v52 }
  0x94   :  { %2324 = vmatprep.subr.mxu1 %v2740_v58  ;;  %2290 = vmatpush3.msra.mxu0 %v2747_v59  ;;  %v2009_v58 = vld [vmem:[%s3539_s4 + $0x8] sm:$0x1] }
  0x95   :  { %2325 = vmatpush3.msra.mxu1 %v2752_v60  ;;  %2291 = vmatprep.subr.mxu0 %v2759_v61  ;;  %v761_v61 = vadd.f32 %v2007_v51, %v2006_v50  ;;  %v736_v43 = vrot.slane %v731_v56, %v3205_v63 }
  0x96   :  { %2326 = vmatprep.subr.mxu1 %v2764_v62  ;;  %2292 = vmatpush3.msra.mxu0 %v2771_v54 }
  0x97   :  { %638 = vmatprep.mubr.f32.mxu0 %v571_v3  ;;  %2327 = vmatpush3.msra.mxu1 %v2778_v55  ;;  %v2008_v55 = vld [vmem:[%s3538_s3 + $0x8] sm:$0x1] }
  0x98   :  { %708 = vmatprep.mubr.f32.mxu1 %v571_v3  ;;  %639 = vmatmul.mubr.f32.vlgmr.msra.gmra.mxu0 %v2005_v2  ;;  %v750_v3 = vrot.slane %v2006_v50, %v3205_v63  ;;  %v2011_v50 = vld [vmem:[%s3539_s4 + $0xc] sm:$0x1] }
  0x99   :  { %709 = vmatmul.mubr.f32.vlgmr.msra.gmra.mxu1 %v2005_v2  ;;  %874 = vmatprep.subr.mxu0 %v2988_v4  ;;  %v793_v2 = vadd.f32 %v2009_v58, %v2008_v55 }
  0x9a   :  { %875 = vmatpush1.msra.mxu0 %v2993_v5  ;;  %964 = vmatprep.subr.mxu1 %v3009_v8 }
  0x9b   :  { %876 = vmatprep.subr.mxu0 %v2998_v6  ;;  %965 = vmatpush1.msra.mxu1 %v3021_v10 }
  0x9c   :  { %877 = vmatpush1.msra.mxu0 %v3004_v7  ;;  %966 = vmatprep.subr.mxu1 %v3041_v13 }
  0x9d   :  { %878 = vmatprep.subr.mxu0 %v3015_v9  ;;  %967 = vmatpush1.msra.mxu1 %v3053_v15 }
  0x9e   :  { %879 = vmatpush1.msra.mxu0 %v3027_v11  ;;  %968 = vmatprep.subr.mxu1 %v3066_v17 }
  0x9f   :  { %880 = vmatprep.subr.mxu0 %v3036_v12  ;;  %969 = vmatpush1.msra.mxu1 %v3076_v19 }
  0xa0   :  { %881 = vmatpush1.msra.mxu0 %v3048_v14  ;;  %970 = vmatprep.subr.mxu1 %v3088_v21 }
  0xa1   :  { %882 = vmatprep.subr.mxu0 %v3060_v16  ;;  %971 = vmatpush1.msra.mxu1 %v3100_v23 }
  0xa2   :  { %883 = vmatpush1.msra.mxu0 %v3071_v18  ;;  %972 = vmatprep.subr.mxu1 %v3110_v25 }
  0xa3   :  { %884 = vmatprep.subr.mxu0 %v3083_v20  ;;  %973 = vmatpush1.msra.mxu1 %v3122_v27 }
  0xa4   :  { %885 = vmatpush1.msra.mxu0 %v3093_v22  ;;  %974 = vmatprep.subr.mxu1 %v3134_v29 }
  0xa5   :  { %886 = vmatprep.subr.mxu0 %v3105_v24  ;;  %975 = vmatpush1.msra.mxu1 %v3146_v31 }
  0xa6   :  { %887 = vmatpush1.msra.mxu0 %v3117_v26  ;;  %922 = vmatprep.mubr.f32.mxu0 %v3553_v34 }
  0xa7   :  { %888 = vmatprep.subr.mxu0 %v3127_v28  ;;  %976 = vmatprep.subr.mxu1 %v3153_v32 }
  0xa8   :  { %889 = vmatpush1.msra.mxu0 %v3139_v30  ;;  %977 = vmatpush1.msra.mxu1 %v3160_v33 }
  0xa9   :  { %1194 = vmatprep.subr.mxu0 %v2988_v4  ;;  %1012 = vmatprep.mubr.f32.mxu1 %v3553_v34 }
  0xaa   :  { %978 = vmatprep.subr.mxu1 %v3167_v35 }
  0xab   :  { %979 = vmatpush1.msra.mxu1 %v3174_v36 }
  0xac   :  { %1284 = vmatprep.subr.mxu1 %v3009_v8 }
  0xf2   :  { %v2083_v37 = vpop.f32.mrf.mxu0 }
  0xf3   :  { %v2118_v38 = vpop.f32.mrf.mxu1 }
  0xf4   :  { %v2084_v39 = vpop.f32.mrf.mxu0 }
  0xf5   :  { %v2119_v40 = vpop.f32.mrf.mxu1  ;;  %v3203_v62 = vadd.f32 %v2084_v39, %v2083_v37  ;;  %v766_v37 = vrot.slane %v761_v61, %v3205_v63  ;;  %v720_v39 = vrot.slane %v714_v52, %v3205_v63 }
  0xf6   :  { %v3207_v47 = vadd.f32 %v2119_v40, %v2118_v38  ;;  %v727_v38 = vrot.slane %v715_v53, %v3205_v63 }
  0xf8   :  { %v3224_v40 = vadd.f32 %v3207_v47, %v3203_v62 }
 0x114   :  { %v2153_v41 = vpop.f32.mrf.mxu0 }
 0x115   :  { %v2188_v42 = vpop.f32.mrf.mxu1 }
 0x116   :  { %v2154_v44 = vpop.f32.mrf.mxu0 }
 0x117   :  { %v2189_v45 = vpop.f32.mrf.mxu1  ;;  %v3199_v59 = vadd.f32 %v2154_v44, %v2153_v41  ;;  %v757_v41 = vrot.slane %v2007_v51, %v3205_v63  ;;  %v782_v44 = vrot.slane %v2008_v55, %v3205_v63  ;;  %v738_v55 = vmul.f32 %v736_v43, %v3224_v40 }
 0x118   :  { %v3201_v60 = vadd.f32 %v2189_v45, %v2188_v42  ;;  %v789_v45 = vrot.slane %v2009_v58, %v3205_v63  ;;  %v729_v58 = vmul.f32 %v3207_v47, %v727_v38 }
 0x119   :  { %v752_v51 = vmul.f32 %v3199_v59, %v750_v3  ;;  %v814_v3 = vrot.slane %v2010_v49, %v3205_v63 }
 0x11a   :  { %v3217_v42 = vadd.f32 %v3201_v60, %v3199_v59  ;;  %v759_v52 = vmul.f32 %v3201_v60, %v757_v41 }
 0x11c   :  { %v768_v53 = vmul.f32 %v766_v37, %v3217_v42  ;;  %v769_v41 = vsub.f32 %v752_v51, %v759_v52 }
 0x11e   :  { %v770_v36 = vsub.f32 %v768_v53, %v752_v51 }
 0x136   :  { %v2223_v46 = vpop.f32.mrf.mxu0 }
 0x137   :  { %v2258_v48 = vpop.f32.mrf.mxu1 }
 0x138   :  { %v2224_v54 = vpop.f32.mrf.mxu0 }
 0x139   :  { %v2259_v57 = vpop.f32.mrf.mxu1  ;;  %v3209_v0 = vadd.f32 %v2224_v54, %v2223_v46  ;;  %v722_v54 = vmul.f32 %v3203_v62, %v720_v39  ;;  %v821_v39 = vrot.slane %v2011_v50, %v3205_v63 }
 0x13a   :  { %v3211_v1 = vadd.f32 %v2259_v57, %v2258_v48  ;;  %v798_v48 = vrot.slane %v793_v2, %v3205_v63  ;;  %v825_v57 = vadd.f32 %v2011_v50, %v2010_v49  ;;  %v771_v50 = vsub.f32 %v770_v36, %v759_v52  ;;  %v2021_v36 = vld [vmem:[%s3538_s3 + $0xd] sm:$0x1] }
 0x13b   :  { %v784_v61 = vmul.f32 %v3209_v0, %v782_v44  ;;  %v740_v43 = vsub.f32 %v738_v55, %v722_v54  ;;  %v739_v44 = vsub.f32 %v722_v54, %v729_v58  ;;  %v2019_v54 = vld [vmem:[%s3538_s3 + $0x9] sm:$0x1]  ;;  %v2022_v52 = vld [vmem:[%s3539_s4 + $0xd] sm:$0x1] }
 0x13c   :  { %v3231_v46 = vadd.f32 %v3211_v1, %v3209_v0  ;;  %v791_v56 = vmul.f32 %v3211_v1, %v789_v45  ;;  %v2017_v45 = vld [vmem:[%s3538_s3 + $0x5] sm:$0x1]  ;;  %v830_v53 = vrot.slane %v825_v57, %v3205_v63  ;;  %v2020_v55 = vld [vmem:[%s3539_s4 + $0x9] sm:$0x1] }
 0x13d   :  { %v1074_v29 = vrot.slane %v2017_v45, %v3205_v63  ;;  %v1115_v28 = vadd.f32 %v2020_v55, %v2019_v54 }
 0x13e   :  { %v800_v2 = vmul.f32 %v798_v48, %v3231_v46  ;;  %v2018_v48 = vld [vmem:[%s3539_s4 + $0x5] sm:$0x1]  ;;  %v801_v49 = vsub.f32 %v784_v61, %v791_v56 }
 0x140   :  { %v802_v51 = vsub.f32 %v800_v2, %v784_v61  ;;  %v772_v2 = vadd.f32 %v769_v41, %v739_v44 }
 0x142   :  { %v803_v4 = vsub.f32 %v802_v51, %v791_v56  ;;  %v804_v32 = vadd.f32 %v801_v49, %v772_v2  ;;  %v1146_v49 = vadd.f32 %v2022_v52, %v2021_v36  ;;  %v1105_v2 = vrot.slane %v2019_v54, %v3205_v63 }
 0x158   :  { %v2293_v34 = vpop.f32.mrf.mxu0 }
 0x159   :  { %v2328_v8 = vpop.f32.mrf.mxu1 }
 0x15a   :  { %v2294_v37 = vpop.f32.mrf.mxu0 }
 0x15b   :  { %v2329_v35 = vpop.f32.mrf.mxu1  ;;  %v3251_v33 = vadd.f32 %v2294_v37, %v2293_v34  ;;  %v2015_v34 = vld [vmem:[%s3538_s3 + $0x1] sm:$0x1]  ;;  %v1084_v37 = vadd.f32 %v2018_v48, %v2017_v45 }
 0x15c   :  { %v3253_v38 = vadd.f32 %v2329_v35, %v2328_v8  ;;  %v2016_v35 = vld [vmem:[%s3539_s4 + $0x1] sm:$0x1]  ;;  %v1045_v44 = vrot.slane %v2015_v34, %v3205_v63 }
 0x15d   :  { %v816_v8 = vmul.f32 %v3251_v33, %v814_v3  ;;  %v741_v3 = vsub.f32 %v740_v43, %v729_v58  ;;  %v1055_v30 = vadd.f32 %v2016_v35, %v2015_v34  ;;  %v1081_v58 = vrot.slane %v2018_v48, %v3205_v63 }
 0x15e   :  { %v823_v57 = vmul.f32 %v3253_v38, %v821_v39  ;;  %v3278_v61 = vadd.f32 %v3253_v38, %v3251_v33  ;;  %v1052_v51 = vrot.slane %v2016_v35, %v3205_v63  ;;  %v1089_v27 = vrot.slane %v1084_v37, %v3205_v63 }
 0x15f   :  { %v773_v41 = vadd.f32 %v771_v50, %v741_v3  ;;  %v1060_v48 = vrot.slane %v1055_v30, %v3205_v63  ;;  %v3612_v34 = vmov 0.0   ;;  %v1083_v35 = vmul.f32 %v3201_v60, %v1081_v58 }
 0x160   :  { %v833_v31 = vsub.f32 %v816_v8, %v823_v57  ;;  %v832_v39 = vmul.f32 %v830_v53, %v3278_v61  ;;  %v1112_v53 = vrot.slane %v2020_v55, %v3205_v63  ;;  %v1143_v50 = vrot.slane %v2022_v52, %v3205_v63 }
 0x161   :  { %v805_v45 = vadd.f32 %v803_v4, %v773_v41  ;;  %v1047_v54 = vmul.f32 %v3203_v62, %v1045_v44  ;;  %v1091_v30 = vmul.f32 %v1089_v27, %v3217_v42  ;;  %v1054_v55 = vmul.f32 %v3207_v47, %v1052_v51  ;;  %v2029_v44 = vld [vmem:[%s3538_s3 + $0x6] sm:$0x1] }
 0x162   :  { %v836_v56 = vadd.f32 %v833_v31, %v804_v32  ;;  %v834_v43 = vsub.f32 %v832_v39, %v816_v8  ;;  %v1120_v31 = vrot.slane %v1115_v28, %v3205_v63  ;;  %v1136_v32 = vrot.slane %v2021_v36, %v3205_v63  ;;  %v2030_v51 = vld [vmem:[%s3539_s4 + $0x6] sm:$0x1] }
 0x163   :  { %v1076_v8 = vmul.f32 %v3199_v59, %v1074_v29  ;;  %v1151_v28 = vrot.slane %v1146_v49, %v3205_v63  ;;  %v1114_v29 = vmul.f32 %v3211_v1, %v1112_v53  ;;  %v1145_v36 = vmul.f32 %v3253_v38, %v1143_v50  ;;  %v2027_v53 = vld [vmem:[%s3538_s3 + $0x2] sm:$0x1] }
 0x164   :  { %2012 = vmatmul.mubr.msk.f32.vlgmr.msra.gmra.mxu0 %vm854_vm0, %v836_v56  ;;  %v835_v26 = vsub.f32 %v834_v43, %v823_v57  ;;  %v1107_v57 = vmul.f32 %v3209_v0, %v1105_v2  ;;  %v1122_v3 = vmul.f32 %v1120_v31, %v3231_v46  ;;  %v1138_v37 = vmul.f32 %v3251_v33, %v1136_v32  ;;  %v2031_v32 = vld [vmem:[%s3538_s3 + $0xa] sm:$0x1] }
 0x165   :  { %1195 = vmatpush1.msra.mxu0 %v2993_v5  ;;  %1242 = vmatprep.mubr.f32.mxu0 %v3612_v34  ;;  %v1092_v27 = vsub.f32 %v1076_v8, %v1083_v35  ;;  %v1093_v52 = vsub.f32 %v1091_v30, %v1076_v8  ;;  %v1153_v39 = vmul.f32 %v1151_v28, %v3278_v61  ;;  %v2032_v8 = vld [vmem:[%s3539_s4 + $0xa] sm:$0x1]  ;;  %v3613_v30 = vld [vmem:[#allocation11_spill] sm:$0xff]  ;;  %v3614_v28 = vld [vmem:[#allocation12_spill] sm:$0xff] }
 0x166   :  { %1196 = vmatprep.subr.mxu0 %v2998_v6  ;;  %v837_v4 = vadd.f32 %v835_v26, %v805_v45  ;;  %v1062_v26 = vmul.f32 %v1060_v48, %v3224_v40  ;;  %v1063_v58 = vsub.f32 %v1047_v54, %v1054_v55  ;;  %v1123_v56 = vsub.f32 %v1107_v57, %v1114_v29  ;;  %v2028_v45 = vld [vmem:[%s3539_s4 + $0x2] sm:$0x1] }
 0x167   :  { %1197 = vmatpush1.msra.mxu0 %v3004_v7  ;;  %v1124_v43 = vsub.f32 %v1122_v3, %v1107_v57  ;;  %v1154_v2 = vsub.f32 %v1138_v37, %v1145_v36  ;;  %v1094_v48 = vsub.f32 %v1093_v52, %v1083_v35  ;;  %v1155_v31 = vsub.f32 %v1153_v39, %v1138_v37  ;;  %v2033_v3 = vld [vmem:[%s3538_s3 + $0xe] sm:$0x1]  ;;  %v3615_v37 = vld [vmem:[#allocation13_spill] sm:$0xff]  ;;  %v3617_v39 = vld [vmem:[#allocation15_spill] sm:$0xff] }
 0x168   :  { %1198 = vmatprep.subr.mxu0 %v3015_v9  ;;  %2013 = vmatmul.mubr.msk.f32.vlgmr.msra.gmra.mxu1 %vm854_vm0, %v837_v4  ;;  %v1064_v41 = vsub.f32 %v1062_v26, %v1047_v54  ;;  %v1095_v49 = vadd.f32 %v1092_v27, %v1063_v58  ;;  %v1404_v35 = vadd.f32 %v2030_v51, %v2029_v44  ;;  %v2034_v27 = vld [vmem:[%s3539_s4 + $0xe] sm:$0x1]  ;;  %v3618_v58 = vld [vmem:[#allocation16_spill] sm:$0xff] }
 0x169   :  { %1199 = vmatpush1.msra.mxu0 %v3027_v11  ;;  %1285 = vmatpush1.msra.mxu1 %v3021_v10  ;;  %v1125_v54 = vsub.f32 %v1124_v43, %v1114_v29  ;;  %v1365_v57 = vrot.slane %v2027_v53, %v3205_v63  ;;  %v1375_v26 = vadd.f32 %v2028_v45, %v2027_v53 }
 0x16a   :  { %1200 = vmatprep.subr.mxu0 %v3036_v12  ;;  %1286 = vmatprep.subr.mxu1 %v3041_v13  ;;  %v1126_v50 = vadd.f32 %v1123_v56, %v1095_v49  ;;  %v1065_v4 = vsub.f32 %v1064_v41, %v1054_v55  ;;  %v3616_v55 = vld [vmem:[#allocation14_spill] sm:$0xff]  ;;  %v1435_v52 = vadd.f32 %v2032_v8, %v2031_v32 }
 0x16b   :  { %1201 = vmatpush1.msra.mxu0 %v3048_v14  ;;  %1287 = vmatpush1.msra.mxu1 %v3053_v15  ;;  %v1156_v41 = vsub.f32 %v1155_v31, %v1145_v36  ;;  %v1372_v43 = vrot.slane %v2028_v45, %v3205_v63  ;;  %v1394_v49 = vrot.slane %v2029_v44, %v3205_v63 }
 0x16c   :  { %1202 = vmatprep.subr.mxu0 %v3060_v16  ;;  %1288 = vmatprep.subr.mxu1 %v3066_v17  ;;  %v1157_v29 = vadd.f32 %v1154_v2, %v1126_v50  ;;  %v1096_v56 = vadd.f32 %v1094_v48, %v1065_v4  ;;  %v1401_v53 = vrot.slane %v2030_v51, %v3205_v63  ;;  %v3620_v50 = vld [vmem:[#allocation8_spill] sm:$0xff]  ;;  %v3622_v51 = vld [vmem:[#allocation19_spill] sm:$0xff] }
 0x16d   :  { %1203 = vmatpush1.msra.mxu0 %v3071_v18  ;;  %1289 = vmatpush1.msra.mxu1 %v3076_v19  ;;  %v1466_v2 = vadd.f32 %v2034_v27, %v2033_v3  ;;  %v1380_v36 = vrot.slane %v1375_v26, %v3205_v63  ;;  %v1425_v45 = vrot.slane %v2031_v32, %v3205_v63  ;;  %v3623_v4 = vld [vmem:[#allocation20_spill] sm:$0xff] }
 0x16e   :  { %1204 = vmatprep.subr.mxu0 %v3083_v20  ;;  %1290 = vmatprep.subr.mxu1 %v3088_v21  ;;  %v1432_v44 = vrot.slane %v2032_v8, %v3205_v63  ;;  %v1440_v48 = vrot.slane %v1435_v52, %v3205_v63  ;;  %v1456_v31 = vrot.slane %v2033_v3, %v3205_v63 }
 0x16f   :  { %1205 = vmatpush1.msra.mxu0 %v3093_v22  ;;  %1291 = vmatpush1.msra.mxu1 %v3100_v23  ;;  %v1403_v26 = vmul.f32 %v3201_v60, %v1401_v53  ;;  %v1463_v32 = vrot.slane %v2034_v27, %v3205_v63  ;;  %v1367_v8 = vmul.f32 %v3203_v62, %v1365_v57 }
 0x170   :  { %1206 = vmatprep.subr.mxu0 %v3105_v24  ;;  %1292 = vmatprep.subr.mxu1 %v3110_v25  ;;  %v1471_v3 = vrot.slane %v1466_v2, %v3205_v63  ;;  %v1374_v52 = vmul.f32 %v3207_v47, %v1372_v43  ;;  %v1434_v27 = vmul.f32 %v3211_v1, %v1432_v44  ;;  %v2042_v44 = vld [vmem:[%s3539_s4 + $0x7] sm:$0x1] }
 0x171   :  { %1207 = vmatpush1.msra.mxu0 %v3613_v30  ;;  %1293 = vmatpush1.msra.mxu1 %v3614_v28  ;;  %v3619_v28 = vld [vmem:[#allocation17_spill] sm:$0xff]  ;;  %v1382_v57 = vmul.f32 %v1380_v36, %v3224_v40  ;;  %v1465_v43 = vmul.f32 %v3253_v38, %v1463_v32 }
 0x172   :  { %1208 = vmatprep.subr.mxu0 %v3615_v37  ;;  %1294 = vmatprep.subr.mxu1 %v3616_v55  ;;  %v1409_v55 = vrot.slane %v1404_v35, %v3205_v63  ;;  %v1473_v2 = vmul.f32 %v1471_v3, %v3278_v61  ;;  %v1383_v36 = vsub.f32 %v1367_v8, %v1374_v52 }
 0x173   :  { %1209 = vmatpush1.msra.mxu0 %v3617_v39  ;;  %1295 = vmatpush1.msra.mxu1 %v3618_v58  ;;  %v3621_v39 = vld [vmem:[#allocation18_spill] sm:$0xff]  ;;  %v1127_v58 = vadd.f32 %v1125_v54, %v1096_v56  ;;  %v1396_v54 = vmul.f32 %v3199_v59, %v1394_v49  ;;  %v3624_v56 = vld [vmem:[#allocation9_spill] sm:$0xff]  ;;  %v1458_v49 = vmul.f32 %v3251_v33, %v1456_v31 }
 0x174   :  { %2023 = vmatmul.mubr.msk.f32.vlgmr.msra.gmra.mxu0 %vm854_vm0, %v1157_v29  ;;  %1296 = vmatprep.subr.mxu1 %v3619_v28  ;;  %v1411_v29 = vmul.f32 %v1409_v55, %v3217_v42  ;;  %v1442_v55 = vmul.f32 %v1440_v48, %v3231_v46  ;;  %v3419_v31 = vld [vmem:[%s3538_s3 + $0x3] sm:$0x1] }
 0x175   :  { %1514 = vmatprep.subr.mxu0 %v3620_v50  ;;  %1297 = vmatpush1.msra.mxu1 %v3621_v39  ;;  %v1158_v35 = vadd.f32 %v1156_v41, %v1127_v58  ;;  %v1427_v58 = vmul.f32 %v3209_v0, %v1425_v45  ;;  %v1412_v41 = vsub.f32 %v1396_v54, %v1403_v26  ;;  %v2041_v45 = vld [vmem:[%s3538_s3 + $0x7] sm:$0x1] }
 0x176   :  { %1515 = vmatpush1.msra.mxu0 %v2993_v5  ;;  %1298 = vmatprep.subr.mxu1 %v3622_v51  ;;  %v1413_v53 = vsub.f32 %v1411_v29, %v1396_v54  ;;  %v3424_v54 = vld [vmem:[%s3539_s4 + $0x3] sm:$0x1]  ;;  %v1474_v3 = vsub.f32 %v1458_v49, %v1465_v43 }
 0x177   :  { %1516 = vmatprep.subr.mxu0 %v2998_v6  ;;  %1299 = vmatpush1.msra.mxu1 %v3623_v4  ;;  %v1443_v48 = vsub.f32 %v1427_v58, %v1434_v27  ;;  %v1444_v32 = vsub.f32 %v1442_v55, %v1427_v58  ;;  %v1415_v29 = vadd.f32 %v1412_v41, %v1383_v36  ;;  %v2044_v58 = vld [vmem:[%s3539_s4 + $0xb] sm:$0x1] }
 0x178   :  { %1332 = vmatprep.mubr.f32.mxu1 %v3612_v34  ;;  %1517 = vmatpush1.msra.mxu0 %v3004_v7  ;;  %v1695_v55 = vadd.f32 %v3424_v54, %v3419_v31 }
 0x179   :  { %2024 = vmatmul.mubr.msk.f32.vlgmr.msra.gmra.mxu1 %vm854_vm0, %v1158_v35  ;;  %1518 = vmatprep.subr.mxu0 %v3015_v9  ;;  %v1384_v35 = vsub.f32 %v1382_v57, %v1367_v8  ;;  %v2043_v8 = vld [vmem:[%s3538_s3 + $0xb] sm:$0x1]  ;;  %v1475_v57 = vsub.f32 %v1473_v2, %v1458_v49  ;;  %v1445_v36 = vsub.f32 %v1444_v32, %v1434_v27  ;;  %v2046_v49 = vld [vmem:[%s3539_s4 + $0xf] sm:$0x1]  ;;  %v3625_v2 = vld [vmem:[#allocation12_spill] sm:$0xff] }
 0x17a   :  { %1604 = vmatprep.subr.mxu1 %v3624_v56  ;;  %1519 = vmatpush1.msra.mxu0 %v3027_v11 }
 0x17b   :  { %1605 = vmatpush1.msra.mxu1 %v3021_v10  ;;  %1520 = vmatprep.subr.mxu0 %v3036_v12  ;;  %v1385_v41 = vsub.f32 %v1384_v35, %v1374_v52  ;;  %v3627_v52 = vld [vmem:[#allocation15_spill] sm:$0xff]  ;;  %v3628_v35 = vld [vmem:[#allocation16_spill] sm:$0xff] }
 0x17c   :  { %1606 = vmatprep.subr.mxu1 %v3041_v13  ;;  %1521 = vmatpush1.msra.mxu0 %v3048_v14 }
 0x17d   :  { %1607 = vmatpush1.msra.mxu1 %v3053_v15  ;;  %1522 = vmatprep.subr.mxu0 %v3060_v16 }
 0x17e   :  { %1608 = vmatprep.subr.mxu1 %v3066_v17  ;;  %1523 = vmatpush1.msra.mxu0 %v3071_v18  ;;  %v1414_v18 = vsub.f32 %v1413_v53, %v1403_v26  ;;  %v1724_v17 = vadd.f32 %v2042_v44, %v2041_v45  ;;  %v1446_v26 = vadd.f32 %v1443_v48, %v1415_v29  ;;  %v3626_v48 = vld [vmem:[#allocation14_spill] sm:$0xff] }
 0x17f   :  { %1609 = vmatpush1.msra.mxu1 %v3076_v19  ;;  %1524 = vmatprep.subr.mxu0 %v3083_v20  ;;  %v1714_v53 = vrot.slane %v2041_v45, %v3205_v63  ;;  %v1476_v29 = vsub.f32 %v1475_v57, %v1465_v43 }
 0x180   :  { %1610 = vmatprep.subr.mxu1 %v3088_v21  ;;  %1525 = vmatpush1.msra.mxu0 %v3093_v22  ;;  %v2045_v22 = vld [vmem:[%s3538_s3 + $0xf] sm:$0x1]  ;;  %v1477_v27 = vadd.f32 %v1474_v3, %v1446_v26  ;;  %v1729_v45 = vrot.slane %v1724_v17, %v3205_v63  ;;  %v1416_v32 = vadd.f32 %v1414_v18, %v1385_v41  ;;  %s1021_s3 = sld [smem:[#allocation2]] }
 0x181   :  { %1611 = vmatpush1.msra.mxu1 %v3100_v23  ;;  %1526 = vmatprep.subr.mxu0 %v3105_v24  ;;  %v1700_v3 = vrot.slane %v1695_v55, %v3205_v63  ;;  %v1745_v17 = vrot.slane %v2043_v8, %v3205_v63  ;;  %v1716_v43 = vmul.f32 %v3199_v59, %v1714_v53 }
 0x182   :  { %1612 = vmatprep.subr.mxu1 %v3110_v25  ;;  %1527 = vmatpush1.msra.mxu0 %v3613_v30  ;;  %v1721_v25 = vrot.slane %v2042_v44, %v3205_v63  ;;  %v1755_v30 = vadd.f32 %v2044_v58, %v2043_v8  ;;  %v1692_v44 = vrot.slane %v3424_v54, %v3205_v63 }
 0x183   :  { %1613 = vmatpush1.msra.mxu1 %v3625_v2  ;;  %1528 = vmatprep.subr.mxu0 %v3615_v37  ;;  %v1685_v2 = vrot.slane %v3419_v31, %v3205_v63  ;;  %v1786_v37 = vadd.f32 %v2046_v49, %v2045_v22  ;;  %v1447_v18 = vadd.f32 %v1445_v36, %v1416_v32 }
 0x184   :  { %1614 = vmatprep.subr.mxu1 %v3626_v48  ;;  %1529 = vmatpush1.msra.mxu0 %v3627_v52  ;;  %v1752_v31 = vrot.slane %v2044_v58, %v3205_v63  ;;  %v1760_v54 = vrot.slane %v1755_v30, %v3205_v63  ;;  %v1723_v57 = vmul.f32 %v3201_v60, %v1721_v25  ;;  %v3633_v30 = vld [vmem:[#allocation11_spill] sm:$0xff] }
 0x185   :  { %1562 = vmatprep.mubr.f32.mxu0 %v3612_v34  ;;  %1615 = vmatpush1.msra.mxu1 %v3628_v35  ;;  %v1731_v55 = vmul.f32 %v1729_v45, %v3217_v42  ;;  %v1776_v8 = vrot.slane %v2045_v22, %v3205_v63  ;;  %v1783_v59 = vrot.slane %v2046_v49, %v3205_v63 }
 0x186   :  { %2035 = vmatmul.mubr.msk.f32.vlgmr.msra.gmra.mxu0 %vm854_vm0, %v1477_v27  ;;  %1616 = vmatprep.subr.mxu1 %v3619_v28  ;;  %v1791_v58 = vrot.slane %v1786_v37, %v3205_v63  ;;  %v1694_v25 = vmul.f32 %v3207_v47, %v1692_v44  ;;  %v1702_v60 = vmul.f32 %v1700_v3, %v3224_v40  ;;  %v3629_v40 = vld [vmem:[#allocation6_spill] sm:$0xff]  ;;  %v3635_v37 = vld [vmem:[#allocation13_spill] sm:$0xff] }
 0x187   :  { %1834 = vmatprep.subr.mxu0 %v3620_v50  ;;  %1617 = vmatpush1.msra.mxu1 %v3621_v39  ;;  %v1478_v50 = vadd.f32 %v1476_v29, %v1447_v18  ;;  %v1754_v22 = vmul.f32 %v3211_v1, %v1752_v31  ;;  %v1762_v63 = vmul.f32 %v1760_v54, %v3231_v46 }
 0x188   :  { %1835 = vmatpush1.msra.mxu0 %v2993_v5  ;;  %1618 = vmatprep.subr.mxu1 %v3622_v51  ;;  %v1687_v5 = vmul.f32 %v3203_v62, %v1685_v2  ;;  %v1733_v62 = vsub.f32 %v1731_v55, %v1716_v43  ;;  %v1778_v47 = vmul.f32 %v3251_v33, %v1776_v8  ;;  %v3631_v33 = vld [vmem:[#allocation7_spill] sm:$0xff]  ;;  %v1022_v2 = vstv %s1021_s3 }
 0x189   :  { %1836 = vmatprep.subr.mxu0 %v2998_v6  ;;  %1619 = vmatpush1.msra.mxu1 %v3623_v4  ;;  %v1747_v6 = vmul.f32 %v3209_v0, %v1745_v17  ;;  %v1793_v0 = vmul.f32 %v1791_v58, %v3278_v61  ;;  %v3632_v61 = vld [vmem:[#allocation10_spill] sm:$0xff] }
 0x18a   :  { %1652 = vmatprep.mubr.f32.mxu1 %v3612_v34  ;;  %1837 = vmatpush1.msra.mxu0 %v3004_v7  ;;  %v1732_v7 = vsub.f32 %v1716_v43, %v1723_v57  ;;  %v1703_v1 = vsub.f32 %v1687_v5, %v1694_v25 }
 0x18b   :  { %2036 = vmatmul.mubr.msk.f32.vlgmr.msra.gmra.mxu1 %vm854_vm0, %v1478_v50  ;;  %1838 = vmatprep.subr.mxu0 %v3015_v9  ;;  %v1785_v9 = vmul.f32 %v3253_v38, %v1783_v59  ;;  %v1763_v42 = vsub.f32 %v1747_v6, %v1754_v22  ;;  %v1795_v46 = vsub.f32 %v1793_v0, %v1778_v47 }
 0x18c   :  { %1924 = vmatprep.subr.mxu1 %v3624_v56  ;;  %1839 = vmatpush1.msra.mxu0 %v3027_v11  ;;  %v1704_v11 = vsub.f32 %v1702_v60, %v1687_v5 }
 0x18d   :  { %1925 = vmatpush1.msra.mxu1 %v3021_v10  ;;  %1840 = vmatprep.subr.mxu0 %v3036_v12  ;;  %v1764_v10 = vsub.f32 %v1762_v63, %v1747_v6  ;;  %v3630_v12 = vld [vmem:[#allocation5_spill] sm:$0xff] }
 0x18e   :  { %1926 = vmatprep.subr.mxu1 %v3041_v13  ;;  %1841 = vmatpush1.msra.mxu0 %v3048_v14  ;;  %v1735_v13 = vadd.f32 %v1732_v7, %v1703_v1  ;;  %v1734_v14 = vsub.f32 %v1733_v62, %v1723_v57  ;;  %v1662_v57 = vstv %s2037_s24 }
 0x18f   :  { %1927 = vmatpush1.msra.mxu1 %v3053_v15  ;;  %1842 = vmatprep.subr.mxu0 %v3060_v16  ;;  %v1794_v15 = vsub.f32 %v1778_v47, %v1785_v9  ;;  %v1705_v16 = vsub.f32 %v1704_v11, %v1694_v25  ;;  %v1765_v38 = vsub.f32 %v1764_v10, %v1754_v22  ;;  %v1982_v22 = vstv %s2049_s27 }
 0x190   :  { %1928 = vmatprep.subr.mxu1 %v3629_v40  ;;  %1843 = vmatpush1.msra.mxu0 %v3630_v12 }
 0x191   :  { %1929 = vmatpush1.msra.mxu1 %v3076_v19  ;;  %1844 = vmatprep.subr.mxu0 %v3083_v20  ;;  %v1766_v19 = vadd.f32 %v1763_v42, %v1735_v13  ;;  %v3634_v20 = vld [vmem:[#allocation12_spill] sm:$0xff]  ;;  %v1736_v56 = vadd.f32 %v1734_v14, %v1705_v16 }
 0x192   :  { %1930 = vmatprep.subr.mxu1 %v3088_v21  ;;  %1845 = vmatpush1.msra.mxu0 %v3631_v33 }
 0x193   :  { %1931 = vmatpush1.msra.mxu1 %v3100_v23  ;;  %1846 = vmatprep.subr.mxu0 %v3105_v24  ;;  %v1797_v21 = vadd.f32 %v1794_v15, %v1766_v19  ;;  %v1796_v23 = vsub.f32 %v1795_v46, %v1785_v9  ;;  %v1767_v24 = vadd.f32 %v1765_v38, %v1736_v56 }
 0x194   :  { %1932 = vmatprep.subr.mxu1 %v3632_v61  ;;  %1847 = vmatpush1.msra.mxu0 %v3633_v30 }
 0x195   :  { %1933 = vmatpush1.msra.mxu1 %v3634_v20  ;;  %1848 = vmatprep.subr.mxu0 %v3635_v37  ;;  %v1798_v26 = vadd.f32 %v1796_v23, %v1767_v24 }
 0x196   :  { %1934 = vmatprep.subr.mxu1 %v3626_v48  ;;  %1849 = vmatpush1.msra.mxu0 %v3627_v52 }
 0x197   :  { %1882 = vmatprep.mubr.f32.mxu0 %v3612_v34  ;;  %1935 = vmatpush1.msra.mxu1 %v3628_v35  ;;  %v1342_v35 = vstv %s2025_s23 }
 0x198   :  { %2047 = vmatmul.mubr.msk.f32.vlgmr.msra.gmra.mxu0 %vm854_vm0, %v1797_v21  ;;  %1936 = vmatprep.subr.mxu1 %v3619_v28 }
 0x199   :  { %1937 = vmatpush1.msra.mxu1 %v3621_v39  ;;  %1972 = vmatprep.mubr.f32.mxu1 %v3612_v34 }
 0x19a   :  { %1938 = vmatprep.subr.mxu1 %v3622_v51 }
 0x19b   :  { %1939 = vmatpush1.msra.mxu1 %v3623_v4 }
 0x19c   :  { %2048 = vmatmul.mubr.msk.f32.vlgmr.msra.gmra.mxu1 %vm854_vm0, %v1798_v26 }
 0x224   :  { %v924_v41 = vpop.f32.mrf.mxu0 }
 0x226   :  { %v926_v49 = vpop.f32.mrf.mxu0 }
 0x228   :  { %v1014_v53 = vpop.f32.mrf.mxu1 }
 0x229   :  { %v1019_v36 = vsub.f32 %v924_v41, %v1014_v53 }
 0x22a   :  { %v1016_v48 = vpop.f32.mrf.mxu1 }
 0x22b   :  { %v1020_v28 = vsub.f32 %v926_v49, %v1016_v48  ;;  %v1023_v52 = vadd.f32 %v1022_v2, %v1019_v36 }
 0x22d   :  { %v1024_v27 = vadd.f32 %v1022_v2, %v1020_v28 }
 0x22f   :  { %v1027_v39 = vcombine.low %v1023_v52, %v1024_v27 }
 0x231   :  { %2014 = vst.sshfl [vmem:[%s3543_s8] sm:$0x33 pattern:$0x76325410] %v1027_v39 }
 0x234   :  { %v1244_v34 = vpop.f32.mrf.mxu0 }
 0x236   :  { %v1246_v45 = vpop.f32.mrf.mxu0 }
 0x239   :  { %v1334_v51 = vpop.f32.mrf.mxu1 }
 0x23a   :  { %v1339_v4 = vsub.f32 %v1244_v34, %v1334_v51 }
 0x23b   :  { %v1336_v32 = vpop.f32.mrf.mxu1 }
 0x23c   :  { %v1340_v29 = vsub.f32 %v1246_v45, %v1336_v32  ;;  %v1343_v44 = vadd.f32 %v1342_v35, %v1339_v4 }
 0x23e   :  { %v1344_v3 = vadd.f32 %v1342_v35, %v1340_v29 }
 0x240   :  { %v1347_v17 = vcombine.low %v1343_v44, %v1344_v3 }
 0x242   :  { %2026 = vst.sshfl [vmem:[%s3543_s8 + $0x4] sm:$0x33 pattern:$0x76325410] %v1347_v17 }
 0x246   :  { %v1564_v18 = vpop.f32.mrf.mxu0 }
 0x248   :  { %v1566_v54 = vpop.f32.mrf.mxu0 }
 0x24b   :  { %v1654_v43 = vpop.f32.mrf.mxu1 }
 0x24c   :  { %v1659_v31 = vsub.f32 %v1564_v18, %v1654_v43 }
 0x24d   :  { %v1656_v55 = vpop.f32.mrf.mxu1 }
 0x24e   :  { %v1660_v50 = vsub.f32 %v1566_v54, %v1656_v55  ;;  %v1663_v8 = vadd.f32 %v1662_v57, %v1659_v31 }
 0x250   :  { %v1664_v59 = vadd.f32 %v1662_v57, %v1660_v50 }
 0x252   :  { %v1667_v58 = vcombine.low %v1663_v8, %v1664_v59 }
 0x254   :  { %2038 = vst.sshfl [vmem:[%s3543_s8 + $0x8] sm:$0x33 pattern:$0x76325410] %v1667_v58 }
 0x258   :  { %v1884_v5 = vpop.f32.mrf.mxu0 }
 0x25a   :  { %v1886_v6 = vpop.f32.mrf.mxu0 }
 0x25c   :  { %v1974_v25 = vpop.f32.mrf.mxu1 }
 0x25d   :  { %v1979_v60 = vsub.f32 %v1884_v5, %v1974_v25 }
 0x25e   :  { %v1976_v63 = vpop.f32.mrf.mxu1 }
 0x25f   :  { %v1980_v7 = vsub.f32 %v1886_v6, %v1976_v63  ;;  %v1983_v62 = vadd.f32 %v1982_v22, %v1979_v60 }
 0x261   :  { %v1984_v47 = vadd.f32 %v1982_v22, %v1980_v7 }
 0x263   :  { %v1987_v9 = vcombine.low %v1983_v62, %v1984_v47 }
 0x265   :  { %2050 = vst.sshfl [vmem:[%s3543_s8 + $0xc] sm:$0x33 pattern:$0x76325410] %v1987_v9 }
 0x266   :  { %2001 = vsyncpa [#allocation3], 1 }

</bundles_post_ra>
